<compile_context>
chip_gen: v5e
topology: v5e:2x2
jax: 0.10.0
libtpu: 0.0.40
codegen_flags: <defaults>
</compile_context>

<pallas_src>
import functools

import jax
import jax.numpy as jnp
import numpy as np
from jax import lax
from jax.experimental import pallas as pl
from jax.experimental.pallas import tpu as pltpu


# --------------------------- fused attention + prop + norm + proj ---------------------------
def _gsa_fused_kernel(x_ref, wqkv_ref, hmask_ref, prow_ref, wprojt_ref, wbig_ref, o_ref,
                      *, heads, num_pos, eps):
    f32 = jnp.float32
    x = x_ref[0]                                      # (N, C), MXU dtype
    n_tok, n_chan = x.shape
    cdt = x.dtype

    # ---- fused QKV projection: one (N, C) @ (C, 3C) MXU matmul ----
    qkv = jnp.dot(x, wqkv_ref[...], preferred_element_type=f32)       # (N, 3C) f32 accum
    q = qkv[:, :n_chan].astype(cdt)                                   # cast back for the MXU
    k = qkv[:, n_chan:2 * n_chan].astype(cdt)
    v = qkv[:, 2 * n_chan:].astype(cdt)

    # ---- all heads in two matmuls (block-masked Q stacked over heads along sublanes) ----
    hmask = hmask_ref[...]                            # (heads, C), 0/1 in MXU dtype
    q_bd = jnp.concatenate([q * hmask[h:h + 1, :] for h in range(heads)], axis=0)  # (heads*N, C)
    # logits[h*N + n, m] = sum_d q[n, h*hd + d] * k[m, h*hd + d]
    logits = lax.dot_general(q_bd, k, (((1,), (1,)), ((), ())),
                             preferred_element_type=f32)              # (heads*N, N) f32
    mmax = jnp.max(logits, axis=-1, keepdims=True)
    e = jnp.exp(logits - mmax)
    attn = e * pl.reciprocal(jnp.sum(e, axis=-1, keepdims=True), approx=True)
    o_big = jnp.dot(attn.astype(cdt), v, preferred_element_type=f32)  # (heads*N, C) f32
    # keep each row-block's own head columns and collapse heads -> y (N, C)
    y = o_big[0:n_tok, :] * hmask[0:1, :]
    for h in range(1, heads):
        y = y + o_big[h * n_tok:(h + 1) * n_tok, :] * hmask[h:h + 1, :]
    y = y.astype(f32)

    # ---- local_prop (depthwise ConvTranspose2d) + GroupNorm(1 group) + proj, closed form ----
    sw = prow_ref[0:1, :]         # (1, C)  sum_p wlp[p, c]
    sw2 = prow_ref[1:2, :]        # (1, C)  sum_p wlp[p, c]^2
    blp = prow_ref[2:3, :]        # (1, C)  local_prop bias
    gnw = prow_ref[3:4, :]        # (1, C)  GroupNorm weight
    gnb = prow_ref[4:5, :]        # (1, C)  GroupNorm bias

    pn = float(num_pos * n_tok)                       # P * N
    n_elems = pn * n_chan                             # C * (H*r) * (W*r)

    # z_p[n, c] = y[n, c] * wlp[p, c] + blp[c]; stats over all P positions from column sums.
    sy = jnp.sum(y, axis=0, keepdims=True)            # (1, C)
    sy2 = jnp.sum(y * y, axis=0, keepdims=True)       # (1, C)
    total = jnp.sum(sw * sy, keepdims=True) + pn * jnp.sum(blp, keepdims=True)
    mean = total / n_elems                            # (1, 1)
    # shifted (two-pass) variance: sum((z - mean)^2) / n_elems
    b_sh = blp - mean                                 # (1, C)
    ssq = (jnp.sum(sw2 * sy2 + 2.0 * b_sh * sw * sy, keepdims=True)
           + pn * jnp.sum(b_sh * b_sh, keepdims=True))
    inv = lax.rsqrt(ssq / n_elems + eps)              # (1, 1)

    scale = inv * gnw                                 # (1, C)
    shift = b_sh * scale + gnb                        # (1, C), same for every position p

    # per-position bias row: (1, C) @ (C, C) matmul, tiled P times along lanes in-register.
    t_small = jnp.dot(shift, wprojt_ref[...], preferred_element_type=f32)   # (1, C)
    t_big = jnp.tile(t_small, (1, num_pos))                                  # (1, P*C)

    # all P depthwise-scaled projections as ONE wide MXU matmul: (N, C) @ (C, P*C).
    yn = (y * scale).astype(wbig_ref.dtype)
    big = jnp.dot(yn, wbig_ref[...], preferred_element_type=f32)             # (N, P*C)
    o_ref[0] = (big + t_big).astype(o_ref.dtype)      # one lane-dense store


# ------------------------------------------ wrapper ------------------------------------------
def global_sparse_attention(x, params, *, r, heads, mxu_dtype=jnp.float32, eps=1e-5):
    B, C, H0, W0 = x.shape
    head_dim = C // heads

    # sparse_sampler: AvgPool2d(kernel_size=1, stride=r) == strided subsampling.
    xs = x[:, :, ::r, ::r]
    _, _, H, W = xs.shape
    N = H * W
    P = r * r

    x_tok = jnp.transpose(xs, (0, 2, 3, 1)).reshape(B, N, C).astype(mxu_dtype)

    # qkv conv weight (3C, C): torch output channel o = head*3*hd + s*hd + d, s in {q,k,v}.
    wqkv4 = params["wqkv"].reshape(heads, 3, head_dim, C)
    wq_t = wqkv4[:, 0].reshape(C, C).T                      # (C_in, C_out), c_out = head*hd + d
    wk_t = wqkv4[:, 1].reshape(C, C).T
    wv_t = wqkv4[:, 2].reshape(C, C).T
    w_qkv_all = jnp.concatenate([wq_t, wk_t, wv_t], axis=1).astype(mxu_dtype)   # (C, 3C)

    # head mask: hmask[h, c] = 1 iff channel c belongs to head h (torch .view layout).
    hmask = (jnp.arange(C)[None, :] // head_dim == jnp.arange(heads)[:, None]).astype(mxu_dtype)

    # local_prop (ConvTranspose2d, groups=C, k=r, s=r) weights: (C, 1, r, r) -> (P, C), p=i*r+j.
    wlp = params["w_lp"][:, 0].reshape(C, P).T.astype(jnp.float32)   # (P, C)
    blp = params["b_lp"].reshape(1, C).astype(jnp.float32)
    gnw = params["gn_w"].reshape(1, C).astype(jnp.float32)
    gnb = params["gn_b"].reshape(1, C).astype(jnp.float32)
    wproj_t = params["w_proj"].T.astype(jnp.float32)                 # (C_in, C_out)

    # pack the five (1, C) rows into one (8, C) slab -> a single DMA.
    prow = jnp.concatenate(
        [jnp.sum(wlp, axis=0, keepdims=True),
         jnp.sum(wlp * wlp, axis=0, keepdims=True),
         blp, gnw, gnb,
         jnp.zeros((3, C), jnp.float32)], axis=0)                    # (8, C)

    # wbig[c, p*C + o] = wlp[p, c] * wproj_t[c, o]  -- fuses the P projections into one matmul.
    wbig = (wlp.T[:, :, None] * wproj_t[:, None, :]).reshape(C, P * C).astype(mxu_dtype)

    kernel = functools.partial(_gsa_fused_kernel, heads=heads, num_pos=P, eps=eps)

    out_tok = pl.pallas_call(
        kernel,
        out_shape=jax.ShapeDtypeStruct((B, N, P * C), jnp.float32),
        grid_spec=pltpu.PrefetchScalarGridSpec(
            num_scalar_prefetch=0,
            grid=(B,),
            in_specs=[
                pl.BlockSpec((1, N, C), lambda b: (b, 0, 0)),
                pl.BlockSpec((C, 3 * C), lambda b: (0, 0)),
                pl.BlockSpec((heads, C), lambda b: (0, 0)),
                pl.BlockSpec((8, C), lambda b: (0, 0)),
                pl.BlockSpec((C, C), lambda b: (0, 0)),
                pl.BlockSpec((C, P * C), lambda b: (0, 0)),
            ],
            out_specs=pl.BlockSpec((1, N, P * C), lambda b: (b, 0, 0)),
        ),
        compiler_params=pltpu.CompilerParams(
            dimension_semantics=("parallel",),
            vmem_limit_bytes=32 * 1024 * 1024),
    )(x_tok, w_qkv_all, hmask, prow, wproj_t, wbig)

    # (B, N, P*C) -> NCHW (B, C, H*r, W*r): n=(h,w), p=(i,j), output pixel (h*r+i, w*r+j).
    out = out_tok.reshape(B, H, W, r, r, C)                    # (b, h, w, i, j, c)
    out = jnp.transpose(out, (0, 5, 1, 3, 2, 4))               # (b, c, h, i, w, j)
    return out.reshape(B, C, H * r, W * r)


# --------------------------------------- pure-JAX reference ---------------------------------------
def reference(x, params, *, r, heads, eps=1e-5):
    xs = x[:, :, ::r, ::r]
    B, C, H, W = xs.shape
    hd = C // heads
    qkv = jnp.einsum("oc,bchw->bohw", params["wqkv"], xs).reshape(B, heads, 3 * hd, H * W)
    q, k, v = qkv[:, :, :hd], qkv[:, :, hd:2 * hd], qkv[:, :, 2 * hd:]
    attn = jax.nn.softmax(jnp.einsum("bhdn,bhdm->bhnm", q, k), axis=-1)
    o = jnp.einsum("bhdm,bhnm->bhdn", v, attn).reshape(B, C, H, W)
    wlp = params["w_lp"][:, 0]                                         # (C, r, r)
    z = jnp.einsum("bchw,cij->bchiwj", o, wlp).reshape(B, C, H * r, W * r)
    z = z + params["b_lp"][None, :, None, None]
    mean = z.mean(axis=(1, 2, 3), keepdims=True)
    var = z.var(axis=(1, 2, 3), keepdims=True)
    zn = (z - mean) / jnp.sqrt(var + eps)
    zn = zn * params["gn_w"][None, :, None, None] + params["gn_b"][None, :, None, None]
    return jnp.einsum("oc,bchw->bohw", params["w_proj"], zn)


if __name__ == "__main__":
    B, C, H0, W0 = 2, 32, 16, 16
    heads, r = 4, 2

    key = jax.random.PRNGKey(0)
    ks = jax.random.split(key, 7)
    x = jax.random.normal(ks[0], (B, C, H0, W0), jnp.float32)
    params = {
        "wqkv":   0.1 * jax.random.normal(ks[1], (3 * C, C), jnp.float32),    # Conv2d 1x1, no bias
        "w_lp":   0.1 * jax.random.normal(ks[2], (C, 1, r, r), jnp.float32),  # ConvTranspose2d, groups=C
        "b_lp":   0.1 * jax.random.normal(ks[3], (C,), jnp.float32),
        "gn_w":   1.0 + 0.1 * jax.random.normal(ks[4], (C,), jnp.float32),
        "gn_b":   0.1 * jax.random.normal(ks[5], (C,), jnp.float32),
        "w_proj": 0.1 * jax.random.normal(ks[6], (C, C), jnp.float32),        # Conv2d 1x1, no bias
    }

    ref = reference(x, params, r=r, heads=heads)

    # f32 MXU operands (softmax uses the EUP approximate reciprocal -> ~1e-3 rel error).
    out_f32 = jax.block_until_ready(
        global_sparse_attention(x, params, r=r, heads=heads, mxu_dtype=jnp.float32))
    assert out_f32.shape == (B, C, H0, W0), out_f32.shape
    np.testing.assert_allclose(np.asarray(out_f32), np.asarray(ref), rtol=2e-2, atol=2e-2)

    # bf16 MXU operands (v5e/v6e/v7x fast path): softmax + GroupNorm stats stay in f32.
    out_bf16 = jax.block_until_ready(
        global_sparse_attention(x, params, r=r, heads=heads, mxu_dtype=jnp.bfloat16))
    np.testing.assert_allclose(np.asarray(out_bf16), np.asarray(ref), rtol=5e-2, atol=5e-2)

    print("KERNEL_OK")
</pallas_src>

<mosaic_0001>
module attributes {stable_mosaic.version = 11 : i64} {
  func.func @_gsa_fused_kernel(%arg0: i32, %arg1: memref<1x64x32xf32, #tpu.memory_space<vmem>>, %arg2: memref<32x96xf32, #tpu.memory_space<vmem>>, %arg3: memref<4x32xf32, #tpu.memory_space<vmem>>, %arg4: memref<8x32xf32, #tpu.memory_space<vmem>>, %arg5: memref<32x32xf32, #tpu.memory_space<vmem>>, %arg6: memref<32x128xf32, #tpu.memory_space<vmem>>, %arg7: memref<1x64x128xf32, #tpu.memory_space<vmem>>) attributes {dimension_semantics = [#tpu.dimension_semantics<parallel>], iteration_bounds = array<i64: 2>, scalar_prefetch = 0 : i64, scratch_operands = 0 : i64, tpu.core_type = #tpu.core_type<tc>, window_params = [{transform_indices = @transform_0, window_bounds = array<i64: 1, 64, 32>}, {pipeline_mode = #tpu.pipeline_mode<synchronous>, transform_indices = @transform_1, window_bounds = array<i64: 32, 96>}, {pipeline_mode = #tpu.pipeline_mode<synchronous>, transform_indices = @transform_2, window_bounds = array<i64: 4, 32>}, {pipeline_mode = #tpu.pipeline_mode<synchronous>, transform_indices = @transform_3, window_bounds = array<i64: 8, 32>}, {pipeline_mode = #tpu.pipeline_mode<synchronous>, transform_indices = @transform_4, window_bounds = array<i64: 32, 32>}, {pipeline_mode = #tpu.pipeline_mode<synchronous>, transform_indices = @transform_5, window_bounds = array<i64: 32, 128>}, {transform_indices = @transform_6, window_bounds = array<i64: 1, 64, 128>}]} {
    %c0 = arith.constant 0 : index
    %c0_0 = arith.constant 0 : index
    %c0_1 = arith.constant 0 : index
    %0 = vector.load %arg1[%c0, %c0_0, %c0_1] : memref<1x64x32xf32, #tpu.memory_space<vmem>>, vector<1x64x32xf32>
    %1 = vector.shape_cast %0 : vector<1x64x32xf32> to vector<64x32xf32>
    %c0_2 = arith.constant 0 : index
    %c0_3 = arith.constant 0 : index
    %2 = vector.load %arg2[%c0_2, %c0_3] : memref<32x96xf32, #tpu.memory_space<vmem>>, vector<32x96xf32>
    %cst = arith.constant dense<0.000000e+00> : vector<64x96xf32>
    %3 = tpu.matmul %1, %2, %cst {dimension_numbers = #tpu.dot_dimension_numbers<[1], [0], [0], [1], [0, 0, 1, 1], [], []>} : vector<64x32xf32>, vector<32x96xf32>, vector<64x96xf32> -> vector<64x96xf32>
    %4 = vector.extract_strided_slice %3 {offsets = [0, 0], sizes = [64, 32], strides = [1, 1]} : vector<64x96xf32> to vector<64x32xf32>
    %5 = vector.extract_strided_slice %3 {offsets = [0, 32], sizes = [64, 32], strides = [1, 1]} : vector<64x96xf32> to vector<64x32xf32>
    %6 = vector.extract_strided_slice %3 {offsets = [0, 64], sizes = [64, 32], strides = [1, 1]} : vector<64x96xf32> to vector<64x32xf32>
    %c0_4 = arith.constant 0 : index
    %c0_5 = arith.constant 0 : index
    %7 = vector.load %arg3[%c0_4, %c0_5] : memref<4x32xf32, #tpu.memory_space<vmem>>, vector<4x32xf32>
    %8 = vector.extract_strided_slice %7 {offsets = [0, 0], sizes = [1, 32], strides = [1, 1]} : vector<4x32xf32> to vector<1x32xf32>
    %9 = vector.broadcast %8 : vector<1x32xf32> to vector<64x32xf32>
    %10 = arith.mulf %4, %9 : vector<64x32xf32>
    %11 = vector.extract_strided_slice %7 {offsets = [1, 0], sizes = [1, 32], strides = [1, 1]} : vector<4x32xf32> to vector<1x32xf32>
    %12 = vector.broadcast %11 : vector<1x32xf32> to vector<64x32xf32>
    %13 = arith.mulf %4, %12 : vector<64x32xf32>
    %14 = vector.extract_strided_slice %7 {offsets = [2, 0], sizes = [1, 32], strides = [1, 1]} : vector<4x32xf32> to vector<1x32xf32>
    %15 = vector.broadcast %14 : vector<1x32xf32> to vector<64x32xf32>
    %16 = arith.mulf %4, %15 : vector<64x32xf32>
    %17 = vector.extract_strided_slice %7 {offsets = [3, 0], sizes = [1, 32], strides = [1, 1]} : vector<4x32xf32> to vector<1x32xf32>
    %18 = vector.broadcast %17 : vector<1x32xf32> to vector<64x32xf32>
    %19 = arith.mulf %4, %18 : vector<64x32xf32>
    %20 = tpu.concatenate %10, %13, %16, %19 in 0 : vector<64x32xf32>, vector<64x32xf32>, vector<64x32xf32>, vector<64x32xf32> -> vector<256x32xf32>
    %cst_6 = arith.constant dense<0.000000e+00> : vector<256x64xf32>
    %21 = tpu.matmul %20, %5, %cst_6 {dimension_numbers = #tpu.dot_dimension_numbers<[1], [1], [0], [0], [0, 0, 1, 0], [], []>} : vector<256x32xf32>, vector<64x32xf32>, vector<256x64xf32> -> vector<256x64xf32>
    %cst_7 = arith.constant dense<0xFF800000> : vector<256xf32>
    %22 = vector.multi_reduction <maximumf>, %21, %cst_7 [1] : vector<256x64xf32> to vector<256xf32>
    %23 = vector.shape_cast %22 : vector<256xf32> to vector<256x1xf32>
    %24 = vector.broadcast %23 : vector<256x1xf32> to vector<256x64xf32>
    %25 = arith.subf %21, %24 : vector<256x64xf32>
    %26 = math.exp %25 : vector<256x64xf32>
    %cst_8 = arith.constant dense<0.000000e+00> : vector<256xf32>
    %27 = vector.multi_reduction <add>, %26, %cst_8 [1] : vector<256x64xf32> to vector<256xf32>
    %28 = vector.shape_cast %27 : vector<256xf32> to vector<256x1xf32>
    %29 = tpu.reciprocal %28 {approx = true} : vector<256x1xf32> -> vector<256x1xf32>
    %30 = vector.broadcast %29 : vector<256x1xf32> to vector<256x64xf32>
    %31 = arith.mulf %26, %30 : vector<256x64xf32>
    %cst_9 = arith.constant dense<0.000000e+00> : vector<256x32xf32>
    %32 = tpu.matmul %31, %6, %cst_9 {dimension_numbers = #tpu.dot_dimension_numbers<[1], [0], [0], [1], [0, 0, 1, 1], [], []>} : vector<256x64xf32>, vector<64x32xf32>, vector<256x32xf32> -> vector<256x32xf32>
    %33 = vector.extract_strided_slice %32 {offsets = [0, 0], sizes = [64, 32], strides = [1, 1]} : vector<256x32xf32> to vector<64x32xf32>
    %34 = vector.extract_strided_slice %7 {offsets = [0, 0], sizes = [1, 32], strides = [1, 1]} : vector<4x32xf32> to vector<1x32xf32>
    %35 = vector.broadcast %34 : vector<1x32xf32> to vector<64x32xf32>
    %36 = arith.mulf %33, %35 : vector<64x32xf32>
    %37 = vector.extract_strided_slice %32 {offsets = [64, 0], sizes = [64, 32], strides = [1, 1]} : vector<256x32xf32> to vector<64x32xf32>
    %38 = vector.extract_strided_slice %7 {offsets = [1, 0], sizes = [1, 32], strides = [1, 1]} : vector<4x32xf32> to vector<1x32xf32>
    %39 = vector.broadcast %38 : vector<1x32xf32> to vector<64x32xf32>
    %40 = arith.mulf %37, %39 : vector<64x32xf32>
    %41 = arith.addf %36, %40 : vector<64x32xf32>
    %42 = vector.extract_strided_slice %32 {offsets = [128, 0], sizes = [64, 32], strides = [1, 1]} : vector<256x32xf32> to vector<64x32xf32>
    %43 = vector.extract_strided_slice %7 {offsets = [2, 0], sizes = [1, 32], strides = [1, 1]} : vector<4x32xf32> to vector<1x32xf32>
    %44 = vector.broadcast %43 : vector<1x32xf32> to vector<64x32xf32>
    %45 = arith.mulf %42, %44 : vector<64x32xf32>
    %46 = arith.addf %41, %45 : vector<64x32xf32>
    %47 = vector.extract_strided_slice %32 {offsets = [192, 0], sizes = [64, 32], strides = [1, 1]} : vector<256x32xf32> to vector<64x32xf32>
    %48 = vector.extract_strided_slice %7 {offsets = [3, 0], sizes = [1, 32], strides = [1, 1]} : vector<4x32xf32> to vector<1x32xf32>
    %49 = vector.broadcast %48 : vector<1x32xf32> to vector<64x32xf32>
    %50 = arith.mulf %47, %49 : vector<64x32xf32>
    %51 = arith.addf %46, %50 : vector<64x32xf32>
    %c0_10 = arith.constant 0 : index
    %c0_11 = arith.constant 0 : index
    %52 = vector.load %arg4[%c0_10, %c0_11] : memref<8x32xf32, #tpu.memory_space<vmem>>, vector<1x32xf32>
    %c1 = arith.constant 1 : index
    %c0_12 = arith.constant 0 : index
    %53 = vector.load %arg4[%c1, %c0_12] : memref<8x32xf32, #tpu.memory_space<vmem>>, vector<1x32xf32>
    %c2 = arith.constant 2 : index
    %c0_13 = arith.constant 0 : index
    %54 = vector.load %arg4[%c2, %c0_13] : memref<8x32xf32, #tpu.memory_space<vmem>>, vector<1x32xf32>
    %c3 = arith.constant 3 : index
    %c0_14 = arith.constant 0 : index
    %55 = vector.load %arg4[%c3, %c0_14] : memref<8x32xf32, #tpu.memory_space<vmem>>, vector<1x32xf32>
    %c4 = arith.constant 4 : index
    %c0_15 = arith.constant 0 : index
    %56 = vector.load %arg4[%c4, %c0_15] : memref<8x32xf32, #tpu.memory_space<vmem>>, vector<1x32xf32>
    %cst_16 = arith.constant dense<0.000000e+00> : vector<32xf32>
    %57 = vector.multi_reduction <add>, %51, %cst_16 [0] : vector<64x32xf32> to vector<32xf32>
    %58 = vector.shape_cast %57 : vector<32xf32> to vector<1x32xf32>
    %59 = arith.mulf %51, %51 : vector<64x32xf32>
    %cst_17 = arith.constant dense<0.000000e+00> : vector<32xf32>
    %60 = vector.multi_reduction <add>, %59, %cst_17 [0] : vector<64x32xf32> to vector<32xf32>
    %61 = vector.shape_cast %60 : vector<32xf32> to vector<1x32xf32>
    %62 = arith.mulf %52, %58 : vector<1x32xf32>
    %63 = vector.shape_cast %62 : vector<1x32xf32> to vector<1x1x32xf32>
    %cst_18 = arith.constant dense<0.000000e+00> : vector<1xf32>
    %64 = vector.multi_reduction <add>, %63, %cst_18 [1, 2] : vector<1x1x32xf32> to vector<1xf32>
    %65 = vector.shape_cast %64 : vector<1xf32> to vector<1x1x1xf32>
    %66 = vector.extract %65[0, 0, 0] : f32 from vector<1x1x1xf32>
    %67 = vector.broadcast %66 : f32 to vector<1x1xf32>
    %68 = vector.shape_cast %54 : vector<1x32xf32> to vector<1x1x32xf32>
    %cst_19 = arith.constant dense<0.000000e+00> : vector<1xf32>
    %69 = vector.multi_reduction <add>, %68, %cst_19 [1, 2] : vector<1x1x32xf32> to vector<1xf32>
    %70 = vector.shape_cast %69 : vector<1xf32> to vector<1x1x1xf32>
    %71 = vector.extract %70[0, 0, 0] : f32 from vector<1x1x1xf32>
    %72 = vector.broadcast %71 : f32 to vector<1x1xf32>
    %cst_20 = arith.constant 2.560000e+02 : f32
    %73 = vector.broadcast %cst_20 : f32 to vector<1x1xf32>
    %74 = arith.mulf %73, %72 : vector<1x1xf32>
    %75 = arith.addf %67, %74 : vector<1x1xf32>
    %cst_21 = arith.constant 8.192000e+03 : f32
    %76 = vector.broadcast %cst_21 : f32 to vector<1x1xf32>
    %77 = arith.divf %75, %76 : vector<1x1xf32>
    %78 = vector.broadcast %77 : vector<1x1xf32> to vector<1x32xf32>
    %79 = arith.subf %54, %78 : vector<1x32xf32>
    %80 = arith.mulf %53, %61 : vector<1x32xf32>
    %cst_22 = arith.constant 2.000000e+00 : f32
    %81 = vector.broadcast %cst_22 : f32 to vector<1x32xf32>
    %82 = arith.mulf %81, %79 : vector<1x32xf32>
    %83 = arith.mulf %82, %52 : vector<1x32xf32>
    %84 = arith.mulf %83, %58 : vector<1x32xf32>
    %85 = arith.addf %80, %84 : vector<1x32xf32>
    %86 = vector.shape_cast %85 : vector<1x32xf32> to vector<1x1x32xf32>
    %cst_23 = arith.constant dense<0.000000e+00> : vector<1xf32>
    %87 = vector.multi_reduction <add>, %86, %cst_23 [1, 2] : vector<1x1x32xf32> to vector<1xf32>
    %88 = vector.shape_cast %87 : vector<1xf32> to vector<1x1x1xf32>
    %89 = vector.extract %88[0, 0, 0] : f32 from vector<1x1x1xf32>
    %90 = vector.broadcast %89 : f32 to vector<1x1xf32>
    %91 = arith.mulf %79, %79 : vector<1x32xf32>
    %92 = vector.shape_cast %91 : vector<1x32xf32> to vector<1x1x32xf32>
    %cst_24 = arith.constant dense<0.000000e+00> : vector<1xf32>
    %93 = vector.multi_reduction <add>, %92, %cst_24 [1, 2] : vector<1x1x32xf32> to vector<1xf32>
    %94 = vector.shape_cast %93 : vector<1xf32> to vector<1x1x1xf32>
    %95 = vector.extract %94[0, 0, 0] : f32 from vector<1x1x1xf32>
    %96 = vector.broadcast %95 : f32 to vector<1x1xf32>
    %cst_25 = arith.constant 2.560000e+02 : f32
    %97 = vector.broadcast %cst_25 : f32 to vector<1x1xf32>
    %98 = arith.mulf %97, %96 : vector<1x1xf32>
    %99 = arith.addf %90, %98 : vector<1x1xf32>
    %cst_26 = arith.constant 8.192000e+03 : f32
    %100 = vector.broadcast %cst_26 : f32 to vector<1x1xf32>
    %101 = arith.divf %99, %100 : vector<1x1xf32>
    %cst_27 = arith.constant 9.99999974E-6 : f32
    %102 = vector.broadcast %cst_27 : f32 to vector<1x1xf32>
    %103 = arith.addf %101, %102 : vector<1x1xf32>
    %104 = math.rsqrt %103 : vector<1x1xf32>
    %105 = vector.broadcast %104 : vector<1x1xf32> to vector<1x32xf32>
    %106 = arith.mulf %105, %55 : vector<1x32xf32>
    %107 = arith.mulf %79, %106 : vector<1x32xf32>
    %108 = arith.addf %107, %56 : vector<1x32xf32>
    %c0_28 = arith.constant 0 : index
    %c0_29 = arith.constant 0 : index
    %109 = vector.load %arg5[%c0_28, %c0_29] : memref<32x32xf32, #tpu.memory_space<vmem>>, vector<32x32xf32>
    %cst_30 = arith.constant dense<0.000000e+00> : vector<1x32xf32>
    %110 = tpu.matmul %108, %109, %cst_30 {dimension_numbers = #tpu.dot_dimension_numbers<[1], [0], [0], [1], [0, 0, 1, 1], [], []>} : vector<1x32xf32>, vector<32x32xf32>, vector<1x32xf32> -> vector<1x32xf32>
    %111 = tpu.concatenate %110, %110, %110, %110 in 1 : vector<1x32xf32>, vector<1x32xf32>, vector<1x32xf32>, vector<1x32xf32> -> vector<1x128xf32>
    %112 = vector.broadcast %106 : vector<1x32xf32> to vector<64x32xf32>
    %113 = arith.mulf %51, %112 : vector<64x32xf32>
    %c0_31 = arith.constant 0 : index
    %c0_32 = arith.constant 0 : index
    %114 = vector.load %arg6[%c0_31, %c0_32] : memref<32x128xf32, #tpu.memory_space<vmem>>, vector<32x128xf32>
    %cst_33 = arith.constant dense<0.000000e+00> : vector<64x128xf32>
    %115 = tpu.matmul %113, %114, %cst_33 {dimension_numbers = #tpu.dot_dimension_numbers<[1], [0], [0], [1], [0, 0, 1, 1], [], []>} : vector<64x32xf32>, vector<32x128xf32>, vector<64x128xf32> -> vector<64x128xf32>
    %116 = vector.broadcast %111 : vector<1x128xf32> to vector<64x128xf32>
    %117 = arith.addf %115, %116 : vector<64x128xf32>
    %c0_34 = arith.constant 0 : index
    %c0_35 = arith.constant 0 : index
    %c0_36 = arith.constant 0 : index
    %118 = vector.load %arg7[%c0_34, %c0_35, %c0_36] : memref<1x64x128xf32, #tpu.memory_space<vmem>>, vector<1x64x128xf32>
    %119 = vector.shape_cast %118 : vector<1x64x128xf32> to vector<64x128xf32>
    %120 = vector.shape_cast %117 : vector<64x128xf32> to vector<1x64x128xf32>
    tpu.vector_store %arg7[%c0_34, %c0_35, %c0_36], %120 {strides = array<i32>} : memref<1x64x128xf32, #tpu.memory_space<vmem>>, vector<1x64x128xf32>,
    return
  }
  func.func @transform_0(%arg0: i32) -> (i32, i32, i32) {
    %c0_i32 = arith.constant 0 : i32
    %c0_i32_0 = arith.constant 0 : i32
    %c0_i32_1 = arith.constant 0 : i32
    return %arg0, %c0_i32, %c0_i32_0 : i32, i32, i32
  }
  func.func @transform_1(%arg0: i32) -> (i32, i32) {
    %c0_i32 = arith.constant 0 : i32
    %c0_i32_0 = arith.constant 0 : i32
    %c0_i32_1 = arith.constant 0 : i32
    return %c0_i32, %c0_i32_0 : i32, i32
  }
  func.func @transform_2(%arg0: i32) -> (i32, i32) {
    %c0_i32 = arith.constant 0 : i32
    %c0_i32_0 = arith.constant 0 : i32
    %c0_i32_1 = arith.constant 0 : i32
    return %c0_i32, %c0_i32_0 : i32, i32
  }
  func.func @transform_3(%arg0: i32) -> (i32, i32) {
    %c0_i32 = arith.constant 0 : i32
    %c0_i32_0 = arith.constant 0 : i32
    %c0_i32_1 = arith.constant 0 : i32
    return %c0_i32, %c0_i32_0 : i32, i32
  }
  func.func @transform_4(%arg0: i32) -> (i32, i32) {
    %c0_i32 = arith.constant 0 : i32
    %c0_i32_0 = arith.constant 0 : i32
    %c0_i32_1 = arith.constant 0 : i32
    return %c0_i32, %c0_i32_0 : i32, i32
  }
  func.func @transform_5(%arg0: i32) -> (i32, i32) {
    %c0_i32 = arith.constant 0 : i32
    %c0_i32_0 = arith.constant 0 : i32
    %c0_i32_1 = arith.constant 0 : i32
    return %c0_i32, %c0_i32_0 : i32, i32
  }
  func.func @transform_6(%arg0: i32) -> (i32, i32, i32) {
    %c0_i32 = arith.constant 0 : i32
    %c0_i32_0 = arith.constant 0 : i32
    %c0_i32_1 = arith.constant 0 : i32
    return %arg0, %c0_i32, %c0_i32_0 : i32, i32, i32
  }
}

</mosaic_0001>

<bundles_post_ra>
// kernel: tpu_custom_call.1
= control target key start
LH: loop header
LB: loop body
LE: loop exit
PB: predicated region body
PF: predicated region fallthrough
CT: control target
= control target key end

     0   :  { %11 = vsyncpa [#allocation3], 0  ;;  %s2828_s0 = inlined_call_operand.vmem [shape: f32[2,64,32], index: 0, kind: input, shape index: {}]   ;;  %s2829_s1 = inlined_call_operand.vmem [shape: f32[32,96], index: 1, kind: input, shape index: {}]   ;;  %s2830_s2 = inlined_call_operand.vmem [shape: f32[4,32], index: 2, kind: input, shape index: {}]   ;;  %s2831_s3 = inlined_call_operand.vmem [shape: f32[8,32], index: 3, kind: input, shape index: {}]   ;;  %s2832_s4 = inlined_call_operand.vmem [shape: f32[32,32], index: 4, kind: input, shape index: {}]   ;;  %s2833_s5 = inlined_call_operand.vmem [shape: f32[32,128], index: 5, kind: input, shape index: {}]   ;;  %s2834_s6 = inlined_call_operand.hbm [shape: f32[2,64,128], index: 6, kind: output, shape index: {}]  }
   0x1   :  { %13 = vsyncpa [#allocation3 + $0x1], 0  ;;  %s2026_s21 = smov 0   ;;  %s2028_s22 = smov 0  }
   0x2   :  { %s2030_s23 = smov 0   ;;  %s2032_s24 = smov 0  }
   0x3 LB: > { %s2047_s25 = sadd.s32 4294967295, %s1983_s24   ;;  %s1597_s26 = sadd.s32 4294967294, %s1983_s24   ;;  %s1983_s24 = sphi %s2032_s24, %s2840_s24   ;;  %s1979_s23 = sphi %s2030_s23, %s2839_s23   ;;  %s1975_s22 = sphi %s2028_s22, %s2838_s22   ;;  %s1971_s21 = sphi %s2026_s21, %s2837_s21  }
   0x4   : > { %s2051_s27 = sadd.s32 1, %s1983_s24   ;;  %s157_s28 = sadd.s32 1, %s1979_s23 }
   0x5   : > { %s154_s29 = ssub.s32 %s1983_s24, %s2051_s27  ;;  %p167_p0 = scmp.ne.s32.totalorder %s1979_s23, %s1975_s22 }
   0x6   : > { %p155_p1 = scmp.eq.s32.totalorder %s154_s29, 0  ;;  %p168_p2 = scmp.eq.s32.totalorder %s2047_s25, 1 }
   0x7   : > { %p173_p3 = scmp.ne.s32.totalorder %s1975_s22, %s1971_s21  ;;  %p174_p4 = scmp.eq.s32.totalorder %s1597_s26, 1 }
   0x8   : > { %s2062_s30 = scalar_select %p155_p1, %s1979_s23, %s157_s28  }
   0x9   : > { %p2064_p5 = por %p168_p2, %p167_p0  ;;  %p2068_p6 = por %p174_p4, %p173_p3 }
   0xa   : > { %p1600_p7 = scmp.ge.s32.totalorder %s1983_s24, 1  ;;  %p215_p8 = scmp.lt.s32.totalorder %s1983_s24, 3 }
   0xc   : > { %p216_p9 = pnand %p1600_p7, %p215_p8 }
   0xd   : > { %p245_p10 = scmp.lt.s32.totalorder (!%p216_p9), %s2047_s25, 1  ;;  %s1985_s28 = smov (!%p216_p9), 96  }
   0xe   : > { %219 = sbr.rel (%p216_p9) target bundleno = 1937 (0x791), region = 44  ;;  %s1986_s10 = smov (!%p216_p9), 64  }
  0x13   : > { %v261_v0 = vld [vmem:[%s2829_s1 + $0x18] sm:$0xff]  ;;  %v260_v1 = vld [vmem:[%s2829_s1 + $0x10] sm:$0xff]  ;;  %v259_v2 = vld [vmem:[%s2829_s1 + $0x8] sm:$0xff]  ;;  %s246_s15 = scalar_select %p245_p10, %s2047_s25, 1  ;;  %vm262_vm0 = vcmask 261120   ;;  %vm614_vm1 = vcmask 523264  }
  0x14   : > { %299 = vmatpush.msra.mxu0 %v261_v0  ;;  %v258_v3 = vld [vmem:[%s2829_s1] sm:$0xff]  ;;  %vm1312_vm2 = vcmask 253952   ;;  %vm1430_vm7 = vcmask 785408  }
  0x15   : > { %s1698_s18 = sshll.u32 %s246_s15, 6  ;;  %v328_v29 = vld [vmem:[%s2830_s2] sm:$0xf] }
  0x16   : > { %300 = vmatpush.msra.mxu0 %v260_v1  ;;  %s249_s26 = scalar_lea.vmem %s2828_s0, %s1698_s18  ;;  %v2154_v31 = vperm.slane %v328_v29, 0  ;;  %v2156_v33 = vperm.slane %v328_v29, 1  ;;  %v2178_v40 = vperm.slane %v328_v29, 2  ;;  %v2228_v57 = vperm.slane %v328_v29, 3 }
  0x17   : > { %v250_v4 = vld [vmem:[%s249_s26] sm:$0xff]  ;;  %v251_v5 = vld [vmem:[%s249_s26 + $0x8] sm:$0xff]  ;;  %v252_v6 = vld [vmem:[%s249_s26 + $0x10] sm:$0xff] }
  0x18   : > { %301 = vmatpush.msra.mxu0 %v259_v2  ;;  %v253_v7 = vld [vmem:[%s249_s26 + $0x18] sm:$0xff]  ;;  %v254_v8 = vld [vmem:[%s249_s26 + $0x20] sm:$0xff]  ;;  %v255_v9 = vld [vmem:[%s249_s26 + $0x28] sm:$0xff] }
  0x19   : > { %v256_v10 = vld [vmem:[%s249_s26 + $0x30] sm:$0xff]  ;;  %v257_v11 = vld [vmem:[%s249_s26 + $0x38] sm:$0xff] }
  0x1a   : > { %302 = vmatpush.msra.mxu0 %v258_v3 }
  0x1b   : > { %1604 = vmatmul.msk.f32.vlgmr.msra.gmra.mxu0 %vm262_vm0, %v250_v4 }
  0x23   : > { %1605 = vmatmul.msk.f32.gmra.mxu0 %vm262_vm0, %v251_v5 }
  0x2b   : > { %1606 = vmatmul.msk.f32.gmra.mxu0 %vm262_vm0, %v252_v6 }
  0x33   : > { %1607 = vmatmul.msk.f32.gmra.mxu0 %vm262_vm0, %v253_v7 }
  0x3b   : > { %1608 = vmatmul.msk.f32.gmra.mxu0 %vm262_vm0, %v254_v8 }
  0x43   : > { %1609 = vmatmul.msk.f32.gmra.mxu0 %vm262_vm0, %v255_v9 }
  0x4b   : > { %1610 = vmatmul.msk.f32.gmra.mxu0 %vm262_vm0, %v256_v10 }
  0x53   : > { %1611 = vmatmul.msk.f32.gmra.mxu0 %vm262_vm0, %v257_v11 }
  0x98   : > { %v2099_v12 = vpop.f32.mrf.mxu0 }
  0x99   : > { %v330_v34 = vmul.f32 %v2154_v31, %v2099_v12  ;;  %v348_v42 = vmul.f32 %v2178_v40, %v2099_v12  ;;  %v339_v51 = vmul.f32 %v2156_v33, %v2099_v12  ;;  %v357_v59 = vmul.f32 %v2228_v57, %v2099_v12 }
  0xa0   : > { %v2101_v13 = vpop.f32.mrf.mxu0 }
  0xa1   : > { %v1784_v14 = vpack.i.bf16 %v2099_v12, %v2101_v13  ;;  %v331_v36 = vmul.f32 %v2154_v31, %v2101_v13  ;;  %v349_v44 = vmul.f32 %v2178_v40, %v2101_v13  ;;  %v340_v53 = vmul.f32 %v2156_v33, %v2101_v13 }
  0xa2   : > { %v358_v61 = vmul.f32 %v2228_v57, %v2101_v13 }
  0xa8   : > { %v2105_v15 = vpop.f32.mrf.mxu0 }
  0xa9   : > { %v332_v38 = vmul.f32 %v2154_v31, %v2105_v15  ;;  %v350_v46 = vmul.f32 %v2178_v40, %v2105_v15  ;;  %v341_v55 = vmul.f32 %v2156_v33, %v2105_v15  ;;  %v359_v62 = vmul.f32 %v2228_v57, %v2105_v15 }
  0xb0   : > { %v2107_v16 = vpop.f32.mrf.mxu0 }
  0xb1   : > { %379 = vrot.lane.b32.xlu2 %v2107_v16, %s1985_s28  ;;  %v1779_v17 = vpack.i.bf16 %v2105_v15, %v2107_v16  ;;  %v333_v41 = vmul.f32 %v2154_v31, %v2107_v16  ;;  %v351_v48 = vmul.f32 %v2178_v40, %v2107_v16  ;;  %v342_v58 = vmul.f32 %v2156_v33, %v2107_v16 }
  0xb2   : > { %v360_v63 = vmul.f32 %v2228_v57, %v2107_v16 }
  0xb8   : > { %v2113_v18 = vpop.f32.mrf.mxu0 }
  0xb9   : > { %377 = vrot.lane.b32.xlu2 %v2105_v15, %s1985_s28  ;;  %v334_v43 = vmul.f32 %v2154_v31, %v2113_v18  ;;  %v352_v50 = vmul.f32 %v2178_v40, %v2113_v18  ;;  %v343_v60 = vmul.f32 %v2156_v33, %v2113_v18  ;;  %v361_v0 = vmul.f32 %v2228_v57, %v2113_v18 }
  0xc0   : > { %v2117_v19 = vpop.f32.mrf.mxu0 }
  0xc1   : > { %383 = vrot.lane.b32.xlu1 %v2117_v19, %s1985_s28  ;;  %v1774_v20 = vpack.i.bf16 %v2113_v18, %v2117_v19  ;;  %v344_v35 = vmul.f32 %v2156_v33, %v2117_v19  ;;  %v335_v45 = vmul.f32 %v2154_v31, %v2117_v19  ;;  %v353_v52 = vmul.f32 %v2178_v40, %v2117_v19 }
  0xc2   : > { %v362_v4 = vmul.f32 %v2228_v57, %v2117_v19 }
  0xc8   : > { %v2123_v21 = vpop.f32.mrf.mxu0 }
  0xc9   : > { %381 = vrot.lane.b32.xlu1 %v2113_v18, %s1985_s28  ;;  %v345_v37 = vmul.f32 %v2156_v33, %v2123_v21  ;;  %v336_v47 = vmul.f32 %v2154_v31, %v2123_v21  ;;  %v354_v54 = vmul.f32 %v2178_v40, %v2123_v21  ;;  %v363_v8 = vmul.f32 %v2228_v57, %v2123_v21 }
  0xd0   : > { %v2127_v22 = vpop.f32.mrf.mxu0 }
  0xd1   : > { %373 = vrot.lane.b32.xlu1 %v2099_v12, %s1985_s28  ;;  %387 = vrot.lane.b32.xlu0 %v2127_v22, %s1985_s28  ;;  %v346_v39 = vmul.f32 %v2156_v33, %v2127_v22  ;;  %v337_v49 = vmul.f32 %v2154_v31, %v2127_v22  ;;  %v355_v56 = vmul.f32 %v2178_v40, %v2127_v22 }
  0xd9   : > { %385 = vrot.lane.b32.xlu0 %v2123_v21, %s1985_s28 }
  0xe1   : > { %375 = vrot.lane.b32.xlu0 %v2101_v13, %s1985_s28 }
 0x10b   : > { %v380_v26 = vpop.permute.xlu2 %379 }
 0x113   : > { %v378_v28 = vpop.permute.xlu2 %377 }
 0x133   : > { %v384_v24 = vpop.permute.xlu1 %383 }
 0x13b   : > { %v382_v27 = vpop.permute.xlu1 %381 }
 0x143   : > { %v388_v23 = vpop.permute.xlu0 %387  ;;  %v374_v32 = vpop.permute.xlu1 %373 }
 0x144   : > { %1612 = vmatpush.xpose.msk.msrb.mxu0 %vm262_vm0, %v388_v23  ;;  %1700 = vmatpush.xpose.msk.msra.mxu1 %vm262_vm0, %v388_v23  ;;  %v364_v23 = vmul.f32 %v2228_v57, %v2127_v22 }
 0x14b   : > { %v386_v25 = vpop.permute.xlu0 %385 }
 0x14c   : > { %1613 = vmatpush.xpose.msk.msrb.mxu0 %vm262_vm0, %v386_v25  ;;  %1701 = vmatpush.xpose.msk.msra.mxu1 %vm262_vm0, %v386_v25 }
 0x150   : > { %1614 = vmatpush.xpose.msk.msrb.mxu0 %vm262_vm0, %v384_v24  ;;  %1702 = vmatpush.xpose.msk.msra.mxu1 %vm262_vm0, %v384_v24 }
 0x153   : > { %v376_v30 = vpop.permute.xlu0 %375 }
 0x154   : > { %1615 = vmatpush.xpose.msk.msrb.mxu0 %vm262_vm0, %v382_v27  ;;  %1703 = vmatpush.xpose.msk.msra.mxu1 %vm262_vm0, %v382_v27 }
 0x158   : > { %1616 = vmatpush.xpose.msk.msrb.mxu0 %vm262_vm0, %v380_v26  ;;  %1704 = vmatpush.xpose.msk.msra.mxu1 %vm262_vm0, %v380_v26 }
 0x15c   : > { %1617 = vmatpush.xpose.msk.msrb.mxu0 %vm262_vm0, %v378_v28  ;;  %1705 = vmatpush.xpose.msk.msra.mxu1 %vm262_vm0, %v378_v28 }
 0x160   : > { %1618 = vmatpush.xpose.msk.msrb.mxu0 %vm262_vm0, %v376_v30  ;;  %1706 = vmatpush.xpose.msk.msra.mxu1 %vm262_vm0, %v376_v30 }
 0x164   : > { %1619 = vmatpush.xpose.msk.msrb.mxu0 %vm262_vm0, %v374_v32  ;;  %1707 = vmatpush.xpose.msk.msra.mxu1 %vm262_vm0, %v374_v32  ;;  %v1769_v32 = vpack.i.bf16 %v2123_v21, %v2127_v22 }
 0x167   : > { %1620 = vmatmul.msk.f32.vlgmr.msrb.gmra.mxu0 %vm262_vm0, %v330_v34  ;;  %1633 = vmatmul.msk.f32.vlgmr.msra.gmra.mxu1 %vm262_vm0, %v344_v35 }
 0x16f   : > { %1621 = vmatmul.msk.f32.gmra.mxu0 %vm262_vm0, %v331_v36  ;;  %1634 = vmatmul.msk.f32.gmra.mxu1 %vm262_vm0, %v345_v37 }
 0x177   : > { %1622 = vmatmul.msk.f32.gmra.mxu0 %vm262_vm0, %v332_v38  ;;  %1635 = vmatmul.msk.f32.gmra.mxu1 %vm262_vm0, %v346_v39 }
 0x17f   : > { %1623 = vmatmul.msk.f32.gmra.mxu0 %vm262_vm0, %v333_v41  ;;  %1636 = vmatmul.msk.f32.gmra.mxu1 %vm262_vm0, %v348_v42 }
 0x187   : > { %1624 = vmatmul.msk.f32.gmra.mxu0 %vm262_vm0, %v334_v43  ;;  %1637 = vmatmul.msk.f32.gmra.mxu1 %vm262_vm0, %v349_v44 }
 0x18f   : > { %1625 = vmatmul.msk.f32.gmra.mxu0 %vm262_vm0, %v335_v45  ;;  %1638 = vmatmul.msk.f32.gmra.mxu1 %vm262_vm0, %v350_v46 }
 0x197   : > { %1626 = vmatmul.msk.f32.gmra.mxu0 %vm262_vm0, %v336_v47  ;;  %1639 = vmatmul.msk.f32.gmra.mxu1 %vm262_vm0, %v351_v48 }
 0x19f   : > { %1627 = vmatmul.msk.f32.gmra.mxu0 %vm262_vm0, %v337_v49  ;;  %1640 = vmatmul.msk.f32.gmra.mxu1 %vm262_vm0, %v352_v50 }
 0x1a7   : > { %1628 = vmatmul.msk.f32.gmra.mxu0 %vm262_vm0, %v339_v51  ;;  %1641 = vmatmul.msk.f32.gmra.mxu1 %vm262_vm0, %v353_v52 }
 0x1af   : > { %1629 = vmatmul.msk.f32.gmra.mxu0 %vm262_vm0, %v340_v53  ;;  %1642 = vmatmul.msk.f32.gmra.mxu1 %vm262_vm0, %v354_v54 }
 0x1b7   : > { %1630 = vmatmul.msk.f32.gmra.mxu0 %vm262_vm0, %v341_v55  ;;  %1643 = vmatmul.msk.f32.gmra.mxu1 %vm262_vm0, %v355_v56 }
 0x1bf   : > { %1631 = vmatmul.msk.f32.gmra.mxu0 %vm262_vm0, %v342_v58  ;;  %1644 = vmatmul.msk.f32.gmra.mxu1 %vm262_vm0, %v357_v59 }
 0x1c7   : > { %1632 = vmatmul.msk.f32.gmra.mxu0 %vm262_vm0, %v343_v60  ;;  %1645 = vmatmul.msk.f32.gmra.mxu1 %vm262_vm0, %v358_v61 }
 0x1cf   : > { %1646 = vmatmul.msk.f32.gmra.mxu1 %vm262_vm0, %v359_v62 }
 0x1d7   : > { %1647 = vmatmul.msk.f32.gmra.mxu1 %vm262_vm0, %v360_v63 }
 0x1df   : > { %1648 = vmatmul.msk.f32.gmra.mxu1 %vm262_vm0, %v361_v0 }
 0x1e4   : > { %v518_v1 = vpop.f32.mrf.mxu0  ;;  %v2251_v2 = vpop.f32.mrf.mxu1 }
 0x1e5   : > { %v615_v3 = vsel %vm614_vm1, %v518_v1, -inf }
 0x1e6   : > { %616 = vmax.xlane.f32.xlu2 %v615_v3 }
 0x1e7   : > { %1649 = vmatmul.msk.f32.gmra.mxu1 %vm262_vm0, %v362_v4 }
 0x1ec   : > { %v521_v5 = vpop.f32.mrf.mxu0  ;;  %v2257_v6 = vpop.f32.mrf.mxu1 }
 0x1ed   : > { %v618_v7 = vsel %vm614_vm1, %v521_v5, -inf }
 0x1ee   : > { %619 = vmax.xlane.f32.xlu0 %v618_v7 }
 0x1ef   : > { %1650 = vmatmul.msk.f32.gmra.mxu1 %vm262_vm0, %v363_v8 }
 0x1f4   : > { %v524_v9 = vpop.f32.mrf.mxu0  ;;  %v2263_v10 = vpop.f32.mrf.mxu1 }
 0x1f5   : > { %v621_v11 = vsel %vm614_vm1, %v524_v9, -inf }
 0x1f6   : > { %622 = vmax.xlane.f32.xlu1 %v621_v11 }
 0x1f7   : > { %1651 = vmatmul.msk.f32.gmra.mxu1 %vm262_vm0, %v364_v23 }
 0x1fc   : > { %v527_v24 = vpop.f32.mrf.mxu0  ;;  %v2269_v25 = vpop.f32.mrf.mxu1 }
 0x1fd   : > { %v624_v26 = vsel %vm614_vm1, %v527_v24, -inf }
 0x1fe   : > { %625 = vmax.xlane.f32.xlu2 %v624_v26 }
 0x202   : > { %1775 = vrot.lane.b32.xlu0 %v1774_v20, %s1986_s10 }
 0x204   : > { %v530_v27 = vpop.f32.mrf.mxu0  ;;  %v2276_v28 = vpop.f32.mrf.mxu1 }
 0x205   : > { %v627_v29 = vsel %vm614_vm1, %v530_v27, -inf }
 0x206   : > { %628 = vmax.xlane.f32.xlu2 %v627_v29 }
 0x20c   : > { %v2279_v30 = vpop.f32.mrf.mxu0  ;;  %v2283_v34 = vpop.f32.mrf.mxu1 }
 0x20d   : > { %v630_v37 = vsel %vm614_vm1, %v2279_v30, -inf }
 0x20f   : > { %1770 = vrot.lane.b32.xlu1 %v1769_v32, %s1986_s10 }
 0x214   : > { %v2286_v35 = vpop.f32.mrf.mxu0  ;;  %v2290_v19 = vpop.f32.mrf.mxu1 }
 0x215   : > { %v633_v18 = vsel %vm614_vm1, %v2286_v35, -inf }
 0x216   : > { %634 = vmax.xlane.f32.xlu2 %v633_v18 }
 0x21c   : > { %v2292_v20 = vpop.f32.mrf.mxu1  ;;  %v2294_v36 = vpop.f32.mrf.mxu0 }
 0x21d   : > { %v636_v39 = vsel %vm614_vm1, %v2294_v36, -inf }
 0x224   : > { %v2298_v21 = vpop.f32.mrf.mxu1  ;;  %v2300_v22 = vpop.f32.mrf.mxu0 }
 0x225   : > { %v678_v15 = vsel %vm614_vm1, %v2298_v21, -inf }
 0x22c   : > { %631 = vmax.xlane.f32.xlu0 %v630_v37  ;;  %v2302_v38 = vpop.f32.mrf.mxu1  ;;  %v2306_v41 = vpop.f32.mrf.mxu0 }
 0x22d   : > { %v642_v43 = vsel %vm614_vm1, %v2306_v41, -inf  ;;  %v681_v18 = vsel %vm614_vm1, %v2302_v38, -inf }
 0x234   : > { %v2308_v42 = vpop.f32.mrf.mxu1 }
 0x235   : > { %v684_v37 = vsel %vm614_vm1, %v2308_v42, -inf }
 0x239   : > { %637 = vmax.xlane.f32.xlu1 %v636_v39 }
 0x23c   : > { %v2316_v44 = vpop.f32.mrf.mxu1 }
 0x23d   : > { %v687_v39 = vsel %vm614_vm1, %v2316_v44, -inf }
 0x240   : > { %1785 = vrot.lane.b32.xlu0 %v1784_v14, %s1986_s10 }
 0x241   : > { %643 = vmax.xlane.f32.xlu1 %v642_v43 }
 0x244   : > { %v2318_v45 = vpop.f32.mrf.mxu1 }
 0x24c   : > { %v2320_v49 = vpop.f32.mrf.mxu1 }
 0x254   : > { %v2326_v14 = vpop.f32.mrf.mxu1 }
 0x259   : > { %v617_v46 = vpop.xlane.xlu2 %616 }
 0x25a   : > { %v711_v47 = vsub.f32 %v518_v1, %v617_v46 }
 0x25c   : > { %v743_v48 = vmul.f32 1.442695, %v711_v47  ;;  %v2332_v60 = vpop.f32.mrf.mxu1 }
 0x25d   : > { %v699_v0 = vsel %vm614_vm1, %v2332_v60, -inf }
 0x25e   : > { %1789 = vpow2.f32 %v743_v48 }
 0x261   : > { %v620_v50 = vpop.xlane.xlu0 %619 }
 0x262   : > { %v712_v51 = vsub.f32 %v521_v5, %v620_v50  ;;  %v2340_v5 = vpop.f32.mrf.mxu0 }
 0x263   : > { %v645_v11 = vsel %vm614_vm1, %v2340_v5, -inf }
 0x264   : > { %v2322_v52 = vpop.eup %1789  ;;  %v745_v12 = vmul.f32 1.442695, %v712_v51 }
 0x265   : > { %v807_v13 = vsel %vm614_vm1, %v2322_v52, 0.0 }
 0x266   : > { %1791 = vpow2.f32 %v745_v12  ;;  %808 = vadd.xlane.f32.xlu2 %v807_v13  ;;  %v690_v12 = vsel %vm614_vm1, %v2318_v45, -inf  ;;  %v639_v13 = vsel %vm614_vm1, %v2300_v22, -inf }
 0x269   : > { %v623_v53 = vpop.xlane.xlu1 %622 }
 0x26a   : > { %v713_v54 = vsub.f32 %v524_v9, %v623_v53  ;;  %v2370_v53 = vpop.f32.mrf.mxu0 }
 0x26c   : > { %v2328_v55 = vpop.eup %1791  ;;  %v747_v56 = vmul.f32 1.442695, %v713_v54 }
 0x26d   : > { %v810_v58 = vsel %vm614_vm1, %v2328_v55, 0.0 }
 0x26e   : > { %1793 = vpow2.f32 %v747_v56  ;;  %811 = vadd.xlane.f32.xlu0 %v810_v58  ;;  %v693_v58 = vsel %vm614_vm1, %v2320_v49, -inf }
 0x271   : > { %v626_v59 = vpop.xlane.xlu2 %625 }
 0x272   : > { %v714_v61 = vsub.f32 %v527_v24, %v626_v59  ;;  %v648_v59 = vsel %vm614_vm1, %v2370_v53, -inf }
 0x274   : > { %v2334_v62 = vpop.eup %1793  ;;  %v749_v63 = vmul.f32 1.442695, %v714_v61  ;;  %v1776_v26 = vpop.permute.xlu0 %1775 }
 0x275   : > { %v813_v1 = vsel %vm614_vm1, %v2334_v62, 0.0  ;;  %v1777_v16 = vunpack.i.l.bf16 %v1776_v26 }
 0x276   : > { %1795 = vpow2.f32 %v749_v63  ;;  %700 = vmax.xlane.f32.xlu0 %v699_v0  ;;  %814 = vadd.xlane.f32.xlu1 %v813_v1  ;;  %v2383_v0 = vpop.f32.mrf.mxu0 }
 0x279   : > { %v629_v3 = vpop.xlane.xlu2 %628 }
 0x27a   : > { %v715_v4 = vsub.f32 %v530_v27, %v629_v3  ;;  %v651_v3 = vsel %vm614_vm1, %v2383_v0, -inf }
 0x27c   : > { %v2342_v7 = vpop.eup %1795  ;;  %v751_v8 = vmul.f32 1.442695, %v715_v4 }
 0x27d   : > { %v816_v9 = vsel %vm614_vm1, %v2342_v7, 0.0 }
 0x27e   : > { %1797 = vpow2.f32 %v751_v8  ;;  %1780 = vrot.lane.b32.xlu2 %v1779_v17, %s1986_s10  ;;  %817 = vadd.xlane.f32.xlu0 %v816_v9  ;;  %v1778_v17 = vunpack.i.h.bf16 %v1776_v26  ;;  %v669_v9 = vsel %vm614_vm1, %v2283_v34, -inf  ;;  %v663_v26 = vsel %vm614_vm1, %v2269_v25, -inf }
 0x27f   : > { %646 = vmax.xlane.f32.xlu1 %v645_v11  ;;  %v654_v11 = vsel %vm614_vm1, %v2251_v2, -inf }
 0x281   : > { %v1771_v23 = vpop.permute.xlu1 %1770 }
 0x282   : > { %v1772_v24 = vunpack.i.l.bf16 %v1771_v23  ;;  %v1773_v29 = vunpack.i.h.bf16 %v1771_v23  ;;  %v657_v23 = vsel %vm614_vm1, %v2257_v6, -inf }
 0x284   : > { %v2352_v27 = vpop.eup %1797  ;;  %1095 = vmatpush.msra.mxu2 %v1772_v24  ;;  %1708 = vmatpush.msra.mxu3 %v1772_v24  ;;  %v660_v24 = vsel %vm614_vm1, %v2263_v10, -inf }
 0x285   : > { %v819_v32 = vsel %vm614_vm1, %v2352_v27, 0.0 }
 0x286   : > { %1096 = vmatpush.msra.mxu2 %v1773_v29  ;;  %1709 = vmatpush.msra.mxu3 %v1773_v29 }
 0x287   : > { %820 = vadd.xlane.f32.xlu0 %v819_v32  ;;  %679 = vmax.xlane.f32.xlu1 %v678_v15  ;;  %v666_v15 = vsel %vm614_vm1, %v2276_v28, -inf }
 0x288   : > { %1097 = vmatpush.msra.mxu2 %v1777_v16  ;;  %1710 = vmatpush.msra.mxu3 %v1777_v16 }
 0x289   : > { %v635_v43 = vpop.xlane.xlu2 %634 }
 0x28a   : > { %1098 = vmatpush.msra.mxu2 %v1778_v17  ;;  %1711 = vmatpush.msra.mxu3 %v1778_v17  ;;  %v717_v48 = vsub.f32 %v2286_v35, %v635_v43 }
 0x28c   : > { %v755_v51 = vmul.f32 1.442695, %v717_v48 }
 0x28f   : > { %682 = vmax.xlane.f32.xlu1 %v681_v18 }
 0x297   : > { %685 = vmax.xlane.f32.xlu1 %v684_v37 }
 0x29f   : > { %688 = vmax.xlane.f32.xlu1 %v687_v39  ;;  %v632_v46 = vpop.xlane.xlu0 %631 }
 0x2a0   : > { %v716_v47 = vsub.f32 %v2279_v30, %v632_v46 }
 0x2a2   : > { %v753_v50 = vmul.f32 1.442695, %v716_v47 }
 0x2a4   : > { %1799 = vpow2.f32 %v753_v50 }
 0x2a5   : > { %1801 = vpow2.f32 %v755_v51 }
 0x2a7   : > { %691 = vmax.xlane.f32.xlu1 %v690_v12  ;;  %640 = vmax.xlane.f32.xlu2 %v639_v13 }
 0x2aa   : > { %v2372_v54 = vpop.eup %1799 }
 0x2ab   : > { %v822_v30 = vsel %vm614_vm1, %v2372_v54, 0.0  ;;  %v2381_v63 = vpop.eup %1801 }
 0x2ac   : > { %823 = vadd.xlane.f32.xlu0 %v822_v30  ;;  %v638_v35 = vpop.xlane.xlu1 %637  ;;  %v825_v1 = vsel %vm614_vm1, %v2381_v63, 0.0 }
 0x2ad   : > { %v718_v56 = vsub.f32 %v2294_v36, %v638_v35  ;;  %v696_v36 = vsel %vm614_vm1, %v2326_v14, -inf }
 0x2af   : > { %v757_v61 = vmul.f32 1.442695, %v718_v56  ;;  %694 = vmax.xlane.f32.xlu1 %v693_v58  ;;  %649 = vmax.xlane.f32.xlu2 %v648_v59 }
 0x2b1   : > { %1803 = vpow2.f32 %v757_v61 }
 0x2b2   : > { %v1786_v29 = vpop.permute.xlu0 %1785 }
 0x2b3   : > { %v1787_v46 = vunpack.i.l.bf16 %v1786_v29  ;;  %v1788_v47 = vunpack.i.h.bf16 %v1786_v29 }
 0x2b4   : > { %826 = vadd.xlane.f32.xlu0 %v825_v1  ;;  %v2407_v16 = vpop.xlane.xlu1 %643 }
 0x2b7   : > { %697 = vmax.xlane.f32.xlu1 %v696_v36  ;;  %652 = vmax.xlane.f32.xlu2 %v651_v3  ;;  %v2391_v4 = vpop.eup %1803 }
 0x2b8   : > { %v828_v8 = vsel %vm614_vm1, %v2391_v4, 0.0 }
 0x2bc   : > { %829 = vadd.xlane.f32.xlu0 %v828_v8 }
 0x2bf   : > { %670 = vmax.xlane.f32.xlu1 %v669_v9  ;;  %655 = vmax.xlane.f32.xlu2 %v654_v11 }
 0x2c7   : > { %658 = vmax.xlane.f32.xlu2 %v657_v23 }
 0x2cf   : > { %661 = vmax.xlane.f32.xlu2 %v660_v24  ;;  %v2426_v24 = vpop.f32.mrf.mxu1 }
 0x2d7   : > { %664 = vmax.xlane.f32.xlu2 %v663_v26  ;;  %v702_v26 = vsel %vm614_vm1, %v2426_v24, -inf }
 0x2d9   : > { %v809_v32 = vpop.xlane.xlu2 %808 }
 0x2da   : > { %1805 = vrcp.f32 %v809_v32 }
 0x2df   : > { %667 = vmax.xlane.f32.xlu2 %v666_v15 }
 0x2e0   : > { %v1806_v43 = vpop.eup %1805 }
 0x2e1   : > { %v812_v17 = vpop.xlane.xlu0 %811  ;;  %v1781_v18 = vpop.permute.xlu2 %1780  ;;  %v935_v51 = vmul.f32 %v1806_v43, %v2322_v52 }
 0x2e2   : > { %v1782_v37 = vunpack.i.l.bf16 %v1781_v18  ;;  %v1783_v39 = vunpack.i.h.bf16 %v1781_v18  ;;  %1807 = vrcp.f32 %v812_v17 }
 0x2e4   : > { %1099 = vmatpush.msra.mxu2 %v1782_v37  ;;  %1712 = vmatpush.msra.mxu3 %v1782_v37 }
 0x2e6   : > { %1100 = vmatpush.msra.mxu2 %v1783_v39  ;;  %1713 = vmatpush.msra.mxu3 %v1783_v39 }
 0x2e8   : > { %1101 = vmatpush.msra.mxu2 %v1787_v46  ;;  %1714 = vmatpush.msra.mxu3 %v1787_v46  ;;  %v1808_v12 = vpop.eup %1807 }
 0x2e9   : > { %v2409_v48 = vpop.xlane.xlu0 %700  ;;  %v815_v50 = vpop.xlane.xlu1 %814  ;;  %v936_v13 = vmul.f32 %v1808_v12, %v2328_v55 }
 0x2ea   : > { %1102 = vmatpush.msra.mxu2 %v1788_v47  ;;  %1715 = vmatpush.msra.mxu3 %v1788_v47  ;;  %1809 = vrcp.f32 %v815_v50 }
 0x2eb   : > { %1652 = vmatmul.msk.f32.vlgmr.msra.gmra.mxu2 %vm614_vm1, %v935_v51 }
 0x2f0   : > { %v1810_v56 = vpop.eup %1809 }
 0x2f1   : > { %v818_v35 = vpop.xlane.xlu0 %817  ;;  %v937_v58 = vmul.f32 %v1810_v56, %v2334_v62 }
 0x2f2   : > { %v647_v30 = vpop.xlane.xlu1 %646  ;;  %1811 = vrcp.f32 %v818_v35 }
 0x2f3   : > { %1653 = vmatmul.msk.f32.gmra.mxu2 %vm614_vm1, %v936_v13  ;;  %v721_v46 = vsub.f32 %v2340_v5, %v647_v30 }
 0x2f8   : > { %v1812_v36 = vpop.eup %1811 }
 0x2f9   : > { %v938_v55 = vmul.f32 %v1812_v36, %v2342_v7 }
 0x2fa   : > { %v680_v59 = vpop.xlane.xlu1 %679  ;;  %v821_v52 = vpop.xlane.xlu0 %820 }
 0x2fb   : > { %v732_v61 = vsub.f32 %v2298_v21, %v680_v59  ;;  %1654 = vmatmul.msk.f32.gmra.mxu2 %vm614_vm1, %v937_v58 }
 0x2fd   : > { %v785_v1 = vmul.f32 1.442695, %v732_v61 }
 0x2ff   : > { %1813 = vpow2.f32 %v785_v1 }
 0x300   : > { %1815 = vrcp.f32 %v821_v52 }
 0x302   : > { %v683_v3 = vpop.xlane.xlu1 %682 }
 0x303   : > { %v733_v8 = vsub.f32 %v2302_v38, %v683_v3  ;;  %1655 = vmatmul.msk.f32.gmra.mxu2 %vm614_vm1, %v938_v55 }
 0x305   : > { %v2421_v9 = vpop.eup %1813  ;;  %v787_v62 = vmul.f32 1.442695, %v733_v8 }
 0x306   : > { %v1816_v11 = vpop.eup %1815  ;;  %v870_v21 = vsel %vm614_vm1, %v2421_v9, 0.0 }
 0x307   : > { %1817 = vpow2.f32 %v787_v62  ;;  %871 = vadd.xlane.f32.xlu2 %v870_v21  ;;  %v939_v23 = vmul.f32 %v1816_v11, %v2352_v27  ;;  %v720_v27 = vsub.f32 %v2306_v41, %v2407_v16  ;;  %v763_v41 = vmul.f32 1.442695, %v721_v46 }
 0x309   : > { %v761_v18 = vmul.f32 1.442695, %v720_v27 }
 0x30a   : > { %v686_v37 = vpop.xlane.xlu1 %685 }
 0x30b   : > { %1656 = vmatmul.msk.f32.gmra.mxu2 %vm614_vm1, %v939_v23 }
 0x30d   : > { %v2429_v7 = vpop.eup %1817 }
 0x30e   : > { %v873_v38 = vsel %vm614_vm1, %v2429_v7, 0.0 }
 0x30f   : > { %874 = vadd.xlane.f32.xlu1 %v873_v38  ;;  %703 = vmax.xlane.f32.xlu2 %v702_v26 }
 0x312   : > { %v689_v35 = vpop.xlane.xlu1 %688 }
 0x313   : > { %v735_v55 = vsub.f32 %v2316_v44, %v689_v35  ;;  %v734_v44 = vsub.f32 %v2308_v42, %v686_v37 }
 0x315   : > { %v791_v11 = vmul.f32 1.442695, %v735_v55  ;;  %v789_v27 = vmul.f32 1.442695, %v734_v44 }
 0x31a   : > { %v641_v29 = vpop.xlane.xlu2 %640  ;;  %v692_v3 = vpop.xlane.xlu1 %691 }
 0x31b   : > { %v719_v32 = vsub.f32 %v2300_v22, %v641_v29  ;;  %v736_v26 = vsub.f32 %v2318_v45, %v692_v3 }
 0x31d   : > { %v759_v15 = vmul.f32 1.442695, %v719_v32  ;;  %v675_v32 = vsel %vm614_vm1, %v2292_v20, -inf  ;;  %v793_v42 = vmul.f32 1.442695, %v736_v26 }
 0x31f   : > { %v824_v17 = vpop.xlane.xlu0 %823  ;;  %1819 = vpow2.f32 %v759_v15 }
 0x320   : > { %1821 = vrcp.f32 %v824_v17 }
 0x321   : > { %1823 = vpow2.f32 %v761_v18  ;;  %v2477_v18 = vpop.f32.mrf.mxu1 }
 0x322   : > { %v650_v39 = vpop.xlane.xlu2 %649  ;;  %v695_v15 = vpop.xlane.xlu1 %694 }
 0x323   : > { %v722_v5 = vsub.f32 %v2370_v53, %v650_v39  ;;  %v672_v39 = vsel %vm614_vm1, %v2290_v19, -inf  ;;  %v737_v55 = vsub.f32 %v2320_v49, %v695_v15 }
 0x325   : > { %v2438_v43 = vpop.eup %1819  ;;  %v765_v61 = vmul.f32 1.442695, %v722_v5 }
 0x326   : > { %v1822_v47 = vpop.eup %1821  ;;  %v831_v22 = vsel %vm614_vm1, %v2438_v43, 0.0 }
 0x327   : > { %v827_v50 = vpop.xlane.xlu0 %826  ;;  %832 = vadd.xlane.f32.xlu0 %v831_v22  ;;  %v940_v51 = vmul.f32 %v1822_v47, %v2372_v54  ;;  %v2446_v13 = vpop.eup %1823  ;;  %v705_v47 = vsel %vm614_vm1, %v2477_v18, -inf }
 0x328   : > { %1825 = vrcp.f32 %v827_v50  ;;  %v834_v59 = vsel %vm614_vm1, %v2446_v13, 0.0 }
 0x329   : > { %1657 = vmatmul.msk.f32.gmra.mxu2 %vm614_vm1, %v940_v51  ;;  %1827 = vpow2.f32 %v763_v41 }
 0x32a   : > { %v653_v16 = vpop.xlane.xlu2 %652  ;;  %v698_v50 = vpop.xlane.xlu1 %697 }
 0x32b   : > { %v723_v12 = vsub.f32 %v2383_v0, %v653_v16  ;;  %v738_v35 = vsub.f32 %v2326_v14, %v698_v50 }
 0x32d   : > { %v767_v56 = vmul.f32 1.442695, %v723_v12  ;;  %v2493_v12 = vpop.f32.mrf.mxu1 }
 0x32e   : > { %v1826_v30 = vpop.eup %1825 }
 0x32f   : > { %v830_v58 = vpop.xlane.xlu0 %829  ;;  %1829 = vpow2.f32 %v767_v56  ;;  %835 = vadd.xlane.f32.xlu0 %v834_v59  ;;  %v941_v54 = vmul.f32 %v1826_v30, %v2381_v63  ;;  %v2454_v1 = vpop.eup %1827  ;;  %v797_v59 = vmul.f32 1.442695, %v738_v35 }
 0x330   : > { %1831 = vrcp.f32 %v830_v58  ;;  %v837_v63 = vsel %vm614_vm1, %v2454_v1, 0.0 }
 0x331   : > { %1658 = vmatmul.msk.f32.gmra.mxu2 %vm614_vm1, %v941_v54  ;;  %1833 = vpow2.f32 %v765_v61 }
 0x332   : > { %v656_v0 = vpop.xlane.xlu2 %655 }
 0x333   : > { %v724_v52 = vsub.f32 %v2251_v2, %v656_v0 }
 0x335   : > { %v769_v36 = vmul.f32 1.442695, %v724_v52  ;;  %v2456_v53 = vpop.eup %1829  ;;  %v739_v52 = vsub.f32 %v2332_v60, %v2409_v48 }
 0x336   : > { %v1832_v8 = vpop.eup %1831  ;;  %v843_v62 = vsel %vm614_vm1, %v2456_v53, 0.0 }
 0x337   : > { %1835 = vpow2.f32 %v769_v36  ;;  %838 = vadd.xlane.f32.xlu0 %v837_v63  ;;  %844 = vadd.xlane.f32.xlu2 %v843_v62  ;;  %v942_v2 = vmul.f32 %v1832_v8, %v2391_v4  ;;  %v2465_v23 = vpop.eup %1833  ;;  %v795_v63 = vmul.f32 1.442695, %v737_v55 }
 0x338   : > { %1837 = vpow2.f32 %v791_v11  ;;  %v840_v29 = vsel %vm614_vm1, %v2465_v23, 0.0 }
 0x339   : > { %1659 = vmatmul.msk.f32.gmra.mxu2 %vm614_vm1, %v942_v2  ;;  %1839 = vpow2.f32 %v789_v27  ;;  %v671_v2 = vpop.xlane.xlu1 %670 }
 0x33a   : > { %v659_v21 = vpop.xlane.xlu2 %658  ;;  %1841 = vpow2.f32 %v793_v42  ;;  %v729_v49 = vsub.f32 %v2283_v34, %v671_v2 }
 0x33b   : > { %v725_v45 = vsub.f32 %v2257_v6, %v659_v21 }
 0x33c   : > { %v779_v26 = vmul.f32 1.442695, %v729_v49 }
 0x33d   : > { %v2468_v38 = vpop.eup %1835  ;;  %v771_v22 = vmul.f32 1.442695, %v725_v45 }
 0x33e   : > { %v846_v4 = vsel %vm614_vm1, %v2468_v38, 0.0  ;;  %v2479_v37 = vpop.eup %1837 }
 0x33f   : > { %841 = vadd.xlane.f32.xlu0 %v840_v29  ;;  %676 = vmax.xlane.f32.xlu2 %v675_v32  ;;  %v879_v46 = vsel %vm614_vm1, %v2479_v37, 0.0  ;;  %v2488_v41 = vpop.eup %1839  ;;  %1843 = vpow2.f32 %v771_v22 }
 0x340   : > { %847 = vadd.xlane.f32.xlu1 %v846_v4  ;;  %v2491_v6 = vpop.eup %1841  ;;  %v876_v30 = vsel %vm614_vm1, %v2488_v41, 0.0 }
 0x341   : > { %v882_v58 = vsel %vm614_vm1, %v2491_v6, 0.0 }
 0x342   : > { %v662_v17 = vpop.xlane.xlu2 %661 }
 0x343   : > { %v726_v5 = vsub.f32 %v2263_v10, %v662_v17 }
 0x345   : > { %v773_v54 = vmul.f32 1.442695, %v726_v5  ;;  %v2504_v0 = vpop.eup %1843 }
 0x346   : > { %v849_v8 = vsel %vm614_vm1, %v2504_v0, 0.0 }
 0x347   : > { %673 = vmax.xlane.f32.xlu0 %v672_v39  ;;  %880 = vadd.xlane.f32.xlu2 %v879_v46 }
 0x348   : > { %706 = vmax.xlane.f32.xlu1 %v705_v47 }
 0x34a   : > { %v665_v51 = vpop.xlane.xlu2 %664 }
 0x34b   : > { %v727_v16 = vsub.f32 %v2269_v25, %v665_v51  ;;  %v708_v25 = vsel %vm614_vm1, %v2493_v12, -inf }
 0x34d   : > { %v775_v56 = vmul.f32 1.442695, %v727_v16 }
 0x34f   : > { %1845 = vpow2.f32 %v775_v56  ;;  %877 = vadd.xlane.f32.xlu0 %v876_v30  ;;  %883 = vadd.xlane.f32.xlu2 %v882_v58 }
 0x350   : > { %709 = vmax.xlane.f32.xlu1 %v708_v25  ;;  %1847 = vpow2.f32 %v797_v59 }
 0x351   : > { %1849 = vpow2.f32 %v773_v54 }
 0x352   : > { %v668_v14 = vpop.xlane.xlu2 %667 }
 0x353   : > { %v728_v61 = vsub.f32 %v2276_v28, %v668_v14  ;;  %v799_v28 = vmul.f32 1.442695, %v739_v52 }
 0x355   : > { %v2506_v10 = vpop.eup %1845  ;;  %v777_v36 = vmul.f32 1.442695, %v728_v61 }
 0x356   : > { %v855_v3 = vsel %vm614_vm1, %v2506_v10, 0.0  ;;  %v2515_v62 = vpop.eup %1847 }
 0x357   : > { %1851 = vpow2.f32 %v777_v36  ;;  %850 = vadd.xlane.f32.xlu0 %v849_v8  ;;  %v2517_v60 = vpop.eup %1849  ;;  %v888_v44 = vsel %vm614_vm1, %v2515_v62, 0.0 }
 0x358   : > { %856 = vadd.xlane.f32.xlu1 %v855_v3  ;;  %1853 = vpow2.f32 %v799_v28  ;;  %v852_v21 = vsel %vm614_vm1, %v2517_v60, 0.0 }
 0x359   : > { %1855 = vpow2.f32 %v795_v63 }
 0x35a   : > { %1857 = vpow2.f32 %v779_v26 }
 0x35d   : > { %v2519_v48 = vpop.eup %1851 }
 0x35e   : > { %v858_v11 = vsel %vm614_vm1, %v2519_v48, 0.0  ;;  %v2528_v29 = vpop.eup %1853 }
 0x35f   : > { %859 = vadd.xlane.f32.xlu2 %v858_v11  ;;  %853 = vadd.xlane.f32.xlu0 %v852_v21  ;;  %v2530_v32 = vpop.eup %1855  ;;  %v891_v34 = vsel %vm614_vm1, %v2528_v29, 0.0 }
 0x360   : > { %889 = vadd.xlane.f32.xlu1 %v888_v44  ;;  %v885_v4 = vsel %vm614_vm1, %v2530_v32, 0.0  ;;  %v2536_v15 = vpop.eup %1857 }
 0x361   : > { %v861_v27 = vsel %vm614_vm1, %v2536_v15, 0.0 }
 0x367   : > { %892 = vadd.xlane.f32.xlu2 %v891_v34  ;;  %886 = vadd.xlane.f32.xlu0 %v885_v4 }
 0x36f   : > { %862 = vadd.xlane.f32.xlu0 %v861_v27 }
 0x37a   : > { %v872_v42 = vpop.xlane.xlu2 %871 }
 0x37b   : > { %1859 = vrcp.f32 %v872_v42 }
 0x381   : > { %v1860_v17 = vpop.eup %1859 }
 0x382   : > { %v875_v45 = vpop.xlane.xlu1 %874  ;;  %v704_v39 = vpop.xlane.xlu2 %703  ;;  %v956_v46 = vmul.f32 %v1860_v17, %v2421_v9 }
 0x383   : > { %1861 = vrcp.f32 %v875_v45  ;;  %v740_v47 = vsub.f32 %v2426_v24, %v704_v39 }
 0x384   : > { %1673 = vmatmul.msk.f32.vlgmr.msra.gmra.mxu3 %vm614_vm1, %v956_v46 }
 0x385   : > { %v801_v50 = vmul.f32 1.442695, %v740_v47 }
 0x387   : > { %1863 = vpow2.f32 %v801_v50 }
 0x389   : > { %v1862_v22 = vpop.eup %1861 }
 0x38a   : > { %v957_v51 = vmul.f32 %v1862_v22, %v2429_v7 }
 0x38c   : > { %1674 = vmatmul.msk.f32.gmra.mxu3 %vm614_vm1, %v957_v51 }
 0x38d   : > { %v2545_v16 = vpop.eup %1863 }
 0x38e   : > { %v894_v35 = vsel %vm614_vm1, %v2545_v16, 0.0 }
 0x38f   : > { %895 = vadd.xlane.f32.xlu0 %v894_v35 }
 0x39a   : > { %v833_v56 = vpop.xlane.xlu0 %832 }
 0x39b   : > { %1865 = vrcp.f32 %v833_v56 }
 0x3a1   : > { %v1866_v9 = vpop.eup %1865 }
 0x3a2   : > { %v836_v5 = vpop.xlane.xlu0 %835  ;;  %v943_v24 = vmul.f32 %v1866_v9, %v2438_v43 }
 0x3a3   : > { %1867 = vrcp.f32 %v836_v5 }
 0x3a4   : > { %1660 = vmatmul.msk.f32.gmra.mxu2 %vm614_vm1, %v943_v24 }
 0x3a9   : > { %v1868_v30 = vpop.eup %1867 }
 0x3aa   : > { %v839_v58 = vpop.xlane.xlu0 %838  ;;  %v845_v7 = vpop.xlane.xlu2 %844  ;;  %v944_v25 = vmul.f32 %v1868_v30, %v2446_v13 }
 0x3ab   : > { %1869 = vrcp.f32 %v839_v58 }
 0x3ac   : > { %1661 = vmatmul.msk.f32.gmra.mxu2 %vm614_vm1, %v944_v25 }
 0x3b1   : > { %v1870_v59 = vpop.eup %1869 }
 0x3b2   : > { %v842_v54 = vpop.xlane.xlu0 %841  ;;  %v677_v14 = vpop.xlane.xlu2 %676  ;;  %v945_v61 = vmul.f32 %v1870_v59, %v2454_v1 }
 0x3b3   : > { %1871 = vrcp.f32 %v842_v54  ;;  %v848_v52 = vpop.xlane.xlu1 %847  ;;  %v731_v43 = vsub.f32 %v2292_v20, %v677_v14 }
 0x3b4   : > { %1662 = vmatmul.msk.f32.gmra.mxu2 %vm614_vm1, %v945_v61 }
 0x3b5   : > { %v783_v36 = vmul.f32 1.442695, %v731_v43 }
 0x3b7   : > { %1873 = vpow2.f32 %v783_v36 }
 0x3b8   : > { %1875 = vrcp.f32 %v845_v7  ;;  %v1104_v7 = vpop.f32.mrf.mxu2 }
 0x3b9   : > { %v1872_v55 = vpop.eup %1871 }
 0x3ba   : > { %v674_v3 = vpop.xlane.xlu0 %673  ;;  %v946_v13 = vmul.f32 %v1872_v55, %v2465_v23  ;;  %v881_v44 = vpop.xlane.xlu2 %880 }
 0x3bb   : > { %v730_v8 = vsub.f32 %v2290_v19, %v674_v3  ;;  %v707_v28 = vpop.xlane.xlu1 %706 }
 0x3bc   : > { %1663 = vmatmul.msk.f32.gmra.mxu2 %vm614_vm1, %v946_v13  ;;  %v741_v2 = vsub.f32 %v2477_v18, %v707_v28 }
 0x3bd   : > { %v2559_v63 = vpop.eup %1873  ;;  %v781_v1 = vmul.f32 1.442695, %v730_v8 }
 0x3be   : > { %v867_v20 = vsel %vm614_vm1, %v2559_v63, 0.0  ;;  %v1876_v49 = vpop.eup %1875  ;;  %v803_v11 = vmul.f32 1.442695, %v741_v2 }
 0x3bf   : > { %1877 = vpow2.f32 %v781_v1  ;;  %868 = vadd.xlane.f32.xlu2 %v867_v20  ;;  %v947_v23 = vmul.f32 %v1876_v49, %v2456_v53 }
 0x3c0   : > { %1879 = vrcp.f32 %v848_v52 }
 0x3c2   : > { %v878_v21 = vpop.xlane.xlu0 %877  ;;  %v884_v46 = vpop.xlane.xlu2 %883 }
 0x3c3   : > { %1881 = vrcp.f32 %v878_v21  ;;  %v710_v19 = vpop.xlane.xlu1 %709 }
 0x3c4   : > { %v742_v26 = vsub.f32 %v2493_v12, %v710_v19  ;;  %1664 = vmatmul.msk.f32.gmra.mxu2 %vm614_vm1, %v947_v23  ;;  %1883 = vpow2.f32 %v803_v11 }
 0x3c5   : > { %v2567_v34 = vpop.eup %1877 }
 0x3c6   : > { %v805_v18 = vmul.f32 1.442695, %v742_v26  ;;  %v864_v4 = vsel %vm614_vm1, %v2567_v34, 0.0  ;;  %v1880_v27 = vpop.eup %1879 }
 0x3c7   : > { %865 = vadd.xlane.f32.xlu1 %v864_v4  ;;  %v948_v17 = vmul.f32 %v1880_v27, %v2468_v38 }
 0x3c8   : > { %1885 = vpow2.f32 %v805_v18 }
 0x3c9   : > { %v1882_v42 = vpop.eup %1881  ;;  %1887 = vrcp.f32 %v881_v44 }
 0x3ca   : > { %v851_v53 = vpop.xlane.xlu0 %850  ;;  %v958_v45 = vmul.f32 %v1882_v42, %v2488_v41  ;;  %v2573_v12 = vpop.eup %1883 }
 0x3cb   : > { %1889 = vrcp.f32 %v851_v53  ;;  %v897_v47 = vsel %vm614_vm1, %v2573_v12, 0.0  ;;  %v857_v56 = vpop.xlane.xlu1 %856 }
 0x3cc   : > { %1665 = vmatmul.msk.f32.gmra.mxu2 %vm614_vm1, %v948_v17  ;;  %1675 = vmatmul.msk.f32.gmra.mxu3 %vm614_vm1, %v958_v45  ;;  %1891 = vrcp.f32 %v884_v46 }
 0x3ce   : > { %v2577_v39 = vpop.eup %1885 }
 0x3cf   : > { %v1888_v50 = vpop.eup %1887  ;;  %898 = vadd.xlane.f32.xlu1 %v897_v47  ;;  %v900_v38 = vsel %vm614_vm1, %v2577_v39, 0.0 }
 0x3d0   : > { %901 = vadd.xlane.f32.xlu0 %v900_v38  ;;  %v959_v35 = vmul.f32 %v1888_v50, %v2479_v37 }
 0x3d1   : > { %v1890_v41 = vpop.eup %1889 }
 0x3d2   : > { %v854_v22 = vpop.xlane.xlu0 %853  ;;  %v949_v51 = vmul.f32 %v1890_v41, %v2504_v0  ;;  %v1892_v9 = vpop.eup %1891 }
 0x3d3   : > { %1893 = vrcp.f32 %v854_v22  ;;  %v960_v58 = vmul.f32 %v1892_v9, %v2491_v6  ;;  %v860_v25 = vpop.xlane.xlu2 %859  ;;  %v890_v37 = vpop.xlane.xlu1 %889 }
 0x3d4   : > { %1666 = vmatmul.msk.f32.gmra.mxu2 %vm614_vm1, %v949_v51  ;;  %1676 = vmatmul.msk.f32.gmra.mxu3 %vm614_vm1, %v959_v35  ;;  %1895 = vrcp.f32 %v857_v56  ;;  %v1107_v6 = vpop.f32.mrf.mxu2 }
 0x3d5   : > { %v1201_v44 = vmul.f32 %v1107_v6, %v2154_v31 }
 0x3d9   : > { %v1894_v5 = vpop.eup %1893 }
 0x3da   : > { %v887_v24 = vpop.xlane.xlu0 %886  ;;  %v950_v30 = vmul.f32 %v1894_v5, %v2517_v60  ;;  %v1896_v0 = vpop.eup %1895 }
 0x3db   : > { %1897 = vrcp.f32 %v887_v24  ;;  %v951_v54 = vmul.f32 %v1896_v0, %v2506_v10  ;;  %v893_v60 = vpop.xlane.xlu2 %892 }
 0x3dc   : > { %1667 = vmatmul.msk.f32.gmra.mxu2 %vm614_vm1, %v950_v30  ;;  %1677 = vmatmul.msk.f32.gmra.mxu3 %vm614_vm1, %v960_v58  ;;  %1899 = vrcp.f32 %v860_v25  ;;  %v1110_v3 = vpop.f32.mrf.mxu2 }
 0x3dd   : > { %1901 = vrcp.f32 %v890_v37  ;;  %v1202_v4 = vmul.f32 %v1110_v3, %v2154_v31 }
 0x3de   : > { %1903 = vrcp.f32 %v893_v60 }
 0x3e1   : > { %v1898_v59 = vpop.eup %1897 }
 0x3e2   : > { %v961_v14 = vmul.f32 %v1898_v59, %v2530_v32  ;;  %v1900_v61 = vpop.eup %1899  ;;  %v863_v52 = vpop.xlane.xlu0 %862 }
 0x3e3   : > { %v1902_v43 = vpop.eup %1901  ;;  %1905 = vrcp.f32 %v863_v52  ;;  %v952_v36 = vmul.f32 %v1900_v61, %v2519_v48 }
 0x3e4   : > { %1668 = vmatmul.msk.f32.gmra.mxu2 %vm614_vm1, %v951_v54  ;;  %1678 = vmatmul.msk.f32.gmra.mxu3 %vm614_vm1, %v961_v14  ;;  %v962_v55 = vmul.f32 %v1902_v43, %v2515_v62  ;;  %v1904_v10 = vpop.eup %1903  ;;  %v1113_v28 = vpop.f32.mrf.mxu2 }
 0x3e5   : > { %v963_v8 = vmul.f32 %v1904_v10, %v2528_v29  ;;  %v1200_v29 = vmul.f32 %v1104_v7, %v2154_v31  ;;  %v1203_v46 = vmul.f32 %v1113_v28, %v2154_v31 }
 0x3e9   : > { %v1906_v32 = vpop.eup %1905 }
 0x3ea   : > { %v953_v13 = vmul.f32 %v1906_v32, %v2536_v15 }
 0x3ec   : > { %1669 = vmatmul.msk.f32.gmra.mxu2 %vm614_vm1, %v952_v36  ;;  %1679 = vmatmul.msk.f32.gmra.mxu3 %vm614_vm1, %v962_v55  ;;  %v2603_v48 = vpop.f32.mrf.mxu2 }
 0x3f4   : > { %1670 = vmatmul.msk.f32.gmra.mxu2 %vm614_vm1, %v953_v13  ;;  %1680 = vmatmul.msk.f32.gmra.mxu3 %vm614_vm1, %v963_v8  ;;  %v1119_v20 = vpop.f32.mrf.mxu2 }
 0x3fc   : > { %v1122_v49 = vpop.f32.mrf.mxu2 }
 0x3fd   : > { %v1206_v14 = vmul.f32 %v1122_v49, %v2154_v31 }
 0x402   : > { %v896_v1 = vpop.xlane.xlu0 %895 }
 0x403   : > { %1907 = vrcp.f32 %v896_v1  ;;  %v2636_v1 = vld [vmem:[%s2831_s3 + $0x2] sm:$0x1] }
 0x404   : > { %v2607_v11 = vpop.f32.mrf.mxu2 }
 0x407   : > { %v1167_v30 = vpop.f32.mrf.mxu3 }
 0x408   : > { %v1229_v37 = vmul.f32 %v1167_v30, %v2178_v40 }
 0x409   : > { %v1908_v62 = vpop.eup %1907 }
 0x40a   : > { %v964_v2 = vmul.f32 %v1908_v62, %v2545_v16 }
 0x40c   : > { %1681 = vmatmul.msk.f32.gmra.mxu3 %vm614_vm1, %v964_v2  ;;  %v1324_v2 = vsel %vm1312_vm2, %v2636_v1, 0.0 }
 0x40d   : > { %1325 = vadd.xlane.f32.xlu1 %v1324_v2 }
 0x427   : > { %v1128_v15 = vpop.f32.mrf.mxu2 }
 0x428   : > { %v1208_v21 = vmul.f32 %v1128_v15, %v2156_v33 }
 0x42a   : > { %v2611_v23 = vadd.f32 %v1208_v21, %v1200_v29 }
 0x42f   : > { %v1131_v19 = vpop.f32.mrf.mxu2 }
 0x430   : > { %v1209_v26 = vmul.f32 %v1131_v19, %v2156_v33 }
 0x432   : > { %v1217_v18 = vadd.f32 %v1209_v26, %v1201_v44  ;;  %v869_v17 = vpop.xlane.xlu2 %868 }
 0x437   : > { %v1134_v16 = vpop.f32.mrf.mxu2 }
 0x438   : > { %v1210_v27 = vmul.f32 %v1134_v16, %v2156_v33 }
 0x43a   : > { %v1218_v42 = vadd.f32 %v1210_v27, %v1202_v4  ;;  %v866_v53 = vpop.xlane.xlu1 %865 }
 0x43b   : > { %1909 = vrcp.f32 %v866_v53 }
 0x43c   : > { %1911 = vrcp.f32 %v869_v17 }
 0x43f   : > { %v1137_v45 = vpop.f32.mrf.mxu2 }
 0x440   : > { %v1211_v47 = vmul.f32 %v1137_v45, %v2156_v33 }
 0x441   : > { %v1910_v50 = vpop.eup %1909 }
 0x442   : > { %v1219_v38 = vadd.f32 %v1211_v47, %v1203_v46  ;;  %v899_v41 = vpop.xlane.xlu1 %898  ;;  %v954_v22 = vmul.f32 %v1910_v50, %v2567_v34  ;;  %v1912_v35 = vpop.eup %1911  ;;  %v1205_v34 = vmul.f32 %v1119_v20, %v2154_v31 }
 0x443   : > { %1913 = vrcp.f32 %v899_v41  ;;  %v902_v51 = vpop.xlane.xlu0 %901  ;;  %v955_v5 = vmul.f32 %v1912_v35, %v2559_v63 }
 0x444   : > { %1671 = vmatmul.msk.f32.gmra.mxu2 %vm614_vm1, %v954_v22  ;;  %1915 = vrcp.f32 %v902_v51 }
 0x447   : > { %v1140_v56 = vpop.f32.mrf.mxu2 }
 0x448   : > { %v1212_v45 = vmul.f32 %v1140_v56, %v2156_v33 }
 0x449   : > { %v1914_v9 = vpop.eup %1913 }
 0x44a   : > { %v965_v24 = vmul.f32 %v1914_v9, %v2573_v12  ;;  %v1916_v58 = vpop.eup %1915  ;;  %v1170_v12 = vpop.f32.mrf.mxu3 }
 0x44b   : > { %v966_v59 = vmul.f32 %v1916_v58, %v2577_v39  ;;  %v1230_v60 = vmul.f32 %v1170_v12, %v2178_v40 }
 0x44c   : > { %1672 = vmatmul.msk.f32.gmra.mxu2 %vm614_vm1, %v955_v5  ;;  %1682 = vmatmul.msk.f32.gmra.mxu3 %vm614_vm1, %v965_v24  ;;  %v1207_v5 = vmul.f32 %v2607_v11, %v2154_v31 }
 0x44f   : > { %v1143_v7 = vpop.f32.mrf.mxu2 }
 0x450   : > { %v1213_v25 = vmul.f32 %v1143_v7, %v2156_v33 }
 0x452   : > { %v1221_v0 = vadd.f32 %v1213_v25, %v1205_v34  ;;  %v1173_v43 = vpop.f32.mrf.mxu3 }
 0x453   : > { %v1231_v12 = vmul.f32 %v1173_v43, %v2178_v40 }
 0x454   : > { %1683 = vmatmul.msk.f32.gmra.mxu3 %vm614_vm1, %v966_v59  ;;  %v1237_v63 = vadd.f32 %v1229_v37, %v1221_v0 }
 0x457   : > { %v1146_v54 = vpop.f32.mrf.mxu2 }
 0x458   : > { %v1214_v6 = vmul.f32 %v1146_v54, %v2156_v33 }
 0x45a   : > { %v1222_v61 = vadd.f32 %v1214_v6, %v1206_v14  ;;  %v1176_v36 = vpop.f32.mrf.mxu3 }
 0x45b   : > { %v1240_v4 = vmul.f32 %v1176_v36, %v2228_v57 }
 0x45c   : > { %v1238_v52 = vadd.f32 %v1230_v60, %v1222_v61 }
 0x45f   : > { %v1149_v55 = vpop.f32.mrf.mxu2 }
 0x460   : > { %v1215_v22 = vmul.f32 %v1149_v55, %v2156_v33 }
 0x462   : > { %v1179_v10 = vpop.f32.mrf.mxu3  ;;  %v1223_v25 = vadd.f32 %v1215_v22, %v1207_v5 }
 0x463   : > { %v1241_v19 = vmul.f32 %v1179_v10, %v2228_v57 }
 0x464   : > { %v1239_v60 = vadd.f32 %v1231_v12, %v1223_v25  ;;  %v1987_v25 = vmov 8192.0  }
 0x465   : > { %1917 = vrcp.f32 %v1987_v25 }
 0x467   : > { %v1152_v32 = vpop.f32.mrf.mxu2 }
 0x468   : > { %v1224_v20 = vmul.f32 %v1152_v32, %v2178_v40 }
 0x46a   : > { %v1182_v3 = vpop.f32.mrf.mxu3  ;;  %v1232_v44 = vadd.f32 %v1224_v20, %v2611_v23  ;;  %v1204_v23 = vmul.f32 %v2603_v48, %v2154_v31 }
 0x46b   : > { %v1242_v27 = vmul.f32 %v1182_v3, %v2228_v57 }
 0x46c   : > { %v2651_v46 = vadd.f32 %v1240_v4, %v1232_v44  ;;  %v1220_v41 = vadd.f32 %v1212_v45, %v1204_v23 }
 0x46e   : > { %v1261_v35 = vsel %vm262_vm0, %v2651_v46, 0.0  ;;  %v1282_v23 = vmul.f32 %v2651_v46, %v2651_v46 }
 0x46f   : > { %v1155_v39 = vpop.f32.mrf.mxu2 }
 0x470   : > { %v1225_v62 = vmul.f32 %v1155_v39, %v2178_v40 }
 0x472   : > { %v1185_v13 = vpop.f32.mrf.mxu3  ;;  %v1233_v15 = vadd.f32 %v1225_v62, %v1217_v18 }
 0x473   : > { %v1243_v18 = vmul.f32 %v1185_v13, %v2228_v57 }
 0x474   : > { %v2648_v53 = vadd.f32 %v1241_v19, %v1233_v15 }
 0x477   : > { %v1158_v8 = vpop.f32.mrf.mxu2 }
 0x478   : > { %v1226_v49 = vmul.f32 %v1158_v8, %v2178_v40 }
 0x47a   : > { %v1188_v28 = vpop.f32.mrf.mxu3  ;;  %v1234_v26 = vadd.f32 %v1226_v49, %v1218_v42  ;;  %v1262_v42 = vsel %vm262_vm0, %v2648_v53, 0.0 }
 0x47b   : > { %v1263_v24 = vadd.f32 %v1262_v42, %v1261_v35  ;;  %v1244_v30 = vmul.f32 %v1188_v28, %v2228_v57 }
 0x47c   : > { %v2654_v47 = vadd.f32 %v1242_v27, %v1234_v26 }
 0x47e   : > { %v1264_v56 = vsel %vm262_vm0, %v2654_v47, 0.0  ;;  %v1284_v42 = vmul.f32 %v2654_v47, %v2654_v47 }
 0x47f   : > { %v1265_v34 = vadd.f32 %v1264_v56, %v1263_v24 }
 0x480   : > { %v1326_v2 = vpop.xlane.xlu1 %1325 }
 0x481   : > { %v1327_v20 = vrot.slane %v1326_v2, 4 }
 0x483   : > { %v1328_v49 = vadd.f32 %v1327_v20, %v1326_v2 }
 0x485   : > { %v1329_v15 = vrot.slane %v1328_v49, 2 }
 0x487   : > { %v1330_v44 = vadd.f32 %v1329_v15, %v1328_v49 }
 0x489   : > { %v1331_v4 = vrot.slane %v1330_v44, 1 }
 0x48b   : > { %v1332_v45 = vadd.f32 %v1331_v4, %v1330_v44 }
 0x48f   : > { %v1191_v29 = vpop.f32.mrf.mxu3 }
 0x490   : > { %v1245_v9 = vmul.f32 %v1191_v29, %v2228_v57 }
 0x492   : > { %v2675_v37 = vadd.f32 %v1245_v9, %v1237_v63 }
 0x494   : > { %v1270_v6 = vsel %vm262_vm0, %v2675_v37, 0.0 }
 0x4c7   : > { %v1161_v21 = vpop.f32.mrf.mxu2 }
 0x4c8   : > { %v1227_v16 = vmul.f32 %v1161_v21, %v2178_v40 }
 0x4ca   : > { %v1235_v17 = vadd.f32 %v1227_v16, %v1219_v38 }
 0x4cc   : > { %v2660_v50 = vadd.f32 %v1243_v18, %v1235_v17  ;;  %v1283_v18 = vmul.f32 %v2648_v53, %v2648_v53 }
 0x4ce   : > { %v1266_v33 = vsel %vm262_vm0, %v2660_v50, 0.0  ;;  %v1285_v22 = vmul.f32 %v2660_v50, %v2660_v50 }
 0x4cf   : > { %v1164_v38 = vpop.f32.mrf.mxu2  ;;  %v1194_v51 = vpop.f32.mrf.mxu3  ;;  %v1267_v59 = vadd.f32 %v1266_v33, %v1265_v34 }
 0x4d0   : > { %v1228_v48 = vmul.f32 %v1164_v38, %v2178_v40  ;;  %v1246_v7 = vmul.f32 %v1194_v51, %v2228_v57  ;;  %v1290_v38 = vsel %vm262_vm0, %v1282_v23, 0.0  ;;  %v1293_v51 = vsel %vm262_vm0, %v1284_v42, 0.0 }
 0x4d1   : > { %v1295_v9 = vsel %vm262_vm0, %v1285_v22, 0.0 }
 0x4d2   : > { %v1236_v58 = vadd.f32 %v1228_v48, %v1220_v41  ;;  %v2682_v11 = vadd.f32 %v1246_v7, %v1238_v52  ;;  %v1291_v41 = vsel %vm262_vm0, %v1283_v18, 0.0 }
 0x4d3   : > { %v1292_v56 = vadd.f32 %v1291_v41, %v1290_v38 }
 0x4d4   : > { %v2677_v0 = vadd.f32 %v1244_v30, %v1236_v58  ;;  %v1272_v36 = vsel %vm262_vm0, %v2682_v11, 0.0  ;;  %v1287_v30 = vmul.f32 %v2675_v37, %v2675_v37  ;;  %v1288_v7 = vmul.f32 %v2682_v11, %v2682_v11 }
 0x4d5   : > { %v1294_v48 = vadd.f32 %v1293_v51, %v1292_v56 }
 0x4d6   : > { %v1268_v31 = vsel %vm262_vm0, %v2677_v0, 0.0  ;;  %v1286_v35 = vmul.f32 %v2677_v0, %v2677_v0  ;;  %v1299_v58 = vsel %vm262_vm0, %v1287_v30, 0.0  ;;  %v1301_v12 = vsel %vm262_vm0, %v1288_v7, 0.0  ;;  %v1443_v7 = vld [vmem:[%s2833_s5 + $0x10] sm:$0xff] }
 0x4d7   : > { %v1269_v54 = vadd.f32 %v1268_v31, %v1267_v59  ;;  %v1197_v14 = vpop.f32.mrf.mxu3  ;;  %v1296_v24 = vadd.f32 %v1295_v9, %v1294_v48 }
 0x4d8   : > { %v1247_v61 = vmul.f32 %v1197_v14, %v2228_v57  ;;  %v2696_v57 = vld [vmem:[%s2831_s3] sm:$0x1]  ;;  %v1297_v5 = vsel %vm262_vm0, %v1286_v35, 0.0  ;;  %v1918_v14 = vpop.eup %1917 }
 0x4d9   : > { %v1271_v63 = vadd.f32 %v1270_v6, %v1269_v54  ;;  %v1298_v33 = vadd.f32 %v1297_v5, %v1296_v24  ;;  %vm1342_vm3 = vweird.f32 %v1918_v14  ;;  %v1392_v5 = vld [vmem:[%s2832_s4 + $0x8] sm:$0xff]  ;;  %v1391_v24 = vld [vmem:[%s2832_s4] sm:$0xff] }
 0x4da   : > { %v2689_v55 = vadd.f32 %v1247_v61, %v1239_v60  ;;  %v1338_v60 = vmul.f32 8192.0, %v1918_v14 }
 0x4db   : > { %v1273_v40 = vadd.f32 %v1272_v36, %v1271_v63  ;;  %v1300_v34 = vadd.f32 %v1299_v58, %v1298_v33  ;;  %v1444_v58 = vld [vmem:[%s2833_s5 + $0x18] sm:$0xff] }
 0x4dc   : > { %v1274_v43 = vsel %vm262_vm0, %v2689_v55, 0.0  ;;  %v1289_v59 = vmul.f32 %v2689_v55, %v2689_v55  ;;  %v1339_v63 = vsub.f32 1.0, %v1338_v60 }
 0x4dd   : > { %v1275_v52 = vadd.f32 %v1274_v43, %v1273_v40  ;;  %v1302_v31 = vadd.f32 %v1301_v12, %v1300_v34 }
 0x4de   : > { %v1303_v54 = vsel %vm262_vm0, %v1289_v59, 0.0  ;;  %v1340_v40 = vmul.f32 %v1918_v14, %v1339_v63  ;;  %v1442_v59 = vld [vmem:[%s2833_s5 + $0x8] sm:$0xff] }
 0x4df   : > { %v1276_v10 = vrot.slane %v1275_v52, 4  ;;  %v1304_v6 = vadd.f32 %v1303_v54, %v1302_v31  ;;  %v1441_v31 = vld [vmem:[%s2833_s5] sm:$0xff] }
 0x4e1   : > { %v1277_v32 = vadd.f32 %v1276_v10, %v1275_v52  ;;  %v1305_v61 = vrot.slane %v1304_v6, 4  ;;  %v1341_v52 = vadd.f32 %v1918_v14, %v1340_v40  ;;  %v1259_v40 = vld [vmem:[%s2831_s3 + $0x3] sm:$0x1] }
 0x4e3   : > { %v1278_v3 = vrot.slane %v1277_v32, 2  ;;  %v1306_v36 = vadd.f32 %v1305_v61, %v1304_v6 }
 0x4e5   : > { %v1279_v39 = vadd.f32 %v1278_v3, %v1277_v32  ;;  %v1307_v43 = vrot.slane %v1306_v36, 2 }
 0x4e7   : > { %v1280_v13 = vrot.slane %v1279_v39, 1  ;;  %v1308_v3 = vadd.f32 %v1307_v43, %v1306_v36 }
 0x4e9   : > { %v2698_v8 = vadd.f32 %v1280_v13, %v1279_v39  ;;  %v1343_v13 = vsel %vm1342_vm3, %v1918_v14, %v1341_v52  ;;  %v1309_v2 = vrot.slane %v1308_v3, 1 }
 0x4eb   : > { %v1311_v28 = vmul.f32 %v2698_v8, %v2696_v57  ;;  %v1310_v15 = vadd.f32 %v1309_v2, %v1308_v3 }
 0x4ed   : > { %v1313_v62 = vsel %vm1312_vm2, %v1311_v28, 0.0 }
 0x4ee   : > { %1314 = vadd.xlane.f32.xlu2 %v1313_v62 }
 0x561   : > { %v1315_v29 = vpop.xlane.xlu2 %1314 }
 0x562   : > { %v1316_v21 = vrot.slane %v1315_v29, 4 }
 0x564   : > { %v1317_v19 = vadd.f32 %v1316_v21, %v1315_v29  ;;  %v1257_v21 = vld [vmem:[%s2831_s3 + $0x1] sm:$0x1] }
 0x566   : > { %v1318_v26 = vrot.slane %v1317_v19, 2 }
 0x568   : > { %v1319_v16 = vadd.f32 %v1318_v26, %v1317_v19  ;;  %v1346_v26 = vmul.f32 %v1310_v15, %v1257_v21 }
 0x56a   : > { %v1320_v27 = vrot.slane %v1319_v16, 1 }
 0x56c   : > { %v1321_v17 = vadd.f32 %v1320_v27, %v1319_v16  ;;  %v1394_v27 = vld [vmem:[%s2832_s4 + $0x18] sm:$0xff] }
 0x56d   : > { %1410 = vmatpush.msrb.mxu3 %v1394_v27 }
 0x56e   : > { %1716 = vpush %v1321_v17  ;;  %v1393_v17 = vld [vmem:[%s2832_s4 + $0x10] sm:$0xff] }
 0x56f   : > { %1718 = vpush %v1332_v45  ;;  %1411 = vmatpush.msrb.mxu3 %v1393_v17 }
 0x571   : > { %1412 = vmatpush.msrb.mxu3 %v1392_v5 }
 0x573   : > { %1413 = vmatpush.msrb.mxu3 %v1391_v24 }
 0x575   : > { %1482 = vmatpush.msra.mxu3 %v1444_v58 }
 0x577   : > { %1483 = vmatpush.msra.mxu3 %v1443_v7 }
 0x579   : > { %1484 = vmatpush.msra.mxu3 %v1442_v59 }
 0x57b   : > { %1485 = vmatpush.msra.mxu3 %v1441_v31 }
 0x59f   : > { %s1717_s15 = spop %1716 }
 0x5a0   : > { %s1719_s16 = spop %1718  ;;  %v1323_v39 = vstv %s1717_s15 }
 0x5a1   : > { %v1334_v10 = vstv %s1719_s16  ;;  %s242_s16 = sand.u32 1, %s1975_s22  }
 0x5a2   : > { %v1335_v32 = vmul.f32 256.0, %v1334_v10  ;;  %v1260_v10 = vld [vmem:[%s2831_s3 + $0x4] sm:$0x1] }
 0x5a4   : > { %v1336_v28 = vadd.f32 %v1335_v32, %v1323_v39 }
 0x5a6   : > { %v1344_v62 = vmul.f32 %v1343_v13, %v1336_v28 }
 0x5a8   : > { %v2728_v20 = vsub.f32 %v2636_v1, %v1344_v62 }
 0x5aa   : > { %v1362_v49 = vmul.f32 %v2728_v20, %v2728_v20  ;;  %v1347_v29 = vmul.f32 2.0, %v2728_v20 }
 0x5ac   : > { %v1363_v19 = vsel %vm1312_vm2, %v1362_v49, 0.0  ;;  %v1348_v44 = vmul.f32 %v1347_v29, %v2696_v57 }
 0x5ad   : > { %1364 = vadd.xlane.f32.xlu2 %v1363_v19 }
 0x5ae   : > { %v1349_v16 = vmul.f32 %v1348_v44, %v2698_v8 }
 0x5b0   : > { %v1350_v1 = vadd.f32 %v1349_v16, %v1346_v26 }
 0x5b2   : > { %v1351_v4 = vsel %vm1312_vm2, %v1350_v1, 0.0 }
 0x5b3   : > { %1352 = vadd.xlane.f32.xlu0 %v1351_v4 }
 0x620   : > { %v1365_v45 = vpop.xlane.xlu2 %1364 }
 0x621   : > { %v1366_v57 = vrot.slane %v1365_v45, 4 }
 0x623   : > { %v1367_v18 = vadd.f32 %v1366_v57, %v1365_v45 }
 0x625   : > { %v1368_v23 = vrot.slane %v1367_v18, 2 }
 0x626   : > { %v1353_v42 = vpop.xlane.xlu0 %1352 }
 0x627   : > { %v1354_v8 = vrot.slane %v1353_v42, 4  ;;  %v1369_v22 = vadd.f32 %v1368_v23, %v1367_v18 }
 0x629   : > { %v1355_v41 = vadd.f32 %v1354_v8, %v1353_v42  ;;  %v1370_v35 = vrot.slane %v1369_v22, 1 }
 0x62b   : > { %v1356_v38 = vrot.slane %v1355_v41, 2  ;;  %v1371_v48 = vadd.f32 %v1370_v35, %v1369_v22 }
 0x62d   : > { %v1357_v51 = vadd.f32 %v1356_v38, %v1355_v41 }
 0x62f   : > { %v1358_v56 = vrot.slane %v1357_v51, 1 }
 0x631   : > { %v1359_v9 = vadd.f32 %v1358_v56, %v1357_v51 }
 0x633   : > { %1720 = vpush %v1359_v9 }
 0x634   : > { %1722 = vpush %v1371_v48 }
 0x664   : > { %s1721_s14 = spop %1720 }
 0x665   : > { %s1723_s15 = spop %1722  ;;  %v1361_v34 = vstv %s1721_s14  ;;  %s1941_s14 = scalar_lea.hbm %s2834_s6, 128 }
 0x666   : > { %v1373_v30 = vstv %s1723_s15  ;;  %s1988_s15 = smov 32  }
 0x667   : > { %v1374_v33 = vmul.f32 256.0, %v1373_v30 }
 0x669   : > { %v1375_v25 = vadd.f32 %v1374_v33, %v1361_v34 }
 0x66b   : > { %v1376_v12 = vmul.f32 %v1375_v25, %v1343_v13 }
 0x66d   : > { %v1377_v54 = vadd.f32 1e-05, %v1376_v12 }
 0x66f   : > { %1919 = vrsqrt.f32 %v1377_v54  ;;  %vm1384_vm5 = vweird.f32 %v1377_v54 }
 0x675   : > { %v1920_v14 = vpop.eup %1919 }
 0x676   : > { %v1379_v6 = vmul.f32 %v1920_v14, %v1377_v54  ;;  %vm1385_vm4 = vweird.f32 %v1920_v14 }
 0x677   : > { %vm1386_vm6 = vmor %vm1384_vm5, %vm1385_vm4 }
 0x678   : > { %v1380_v60 = vmul.f32 %v1920_v14, %v1379_v6 }
 0x67a   : > { %v1381_v61 = vmul.f32 0.5, %v1380_v60 }
 0x67c   : > { %v1382_v63 = vsub.f32 1.5, %v1381_v61 }
 0x67e   : > { %v1383_v36 = vmul.f32 %v1920_v14, %v1382_v63 }
 0x680   : > { %v1387_v43 = vsel %vm1386_vm6, %v1920_v14, %v1383_v36 }
 0x681   : > { %v1388_v52 = vmul.f32 %v1387_v43, %v1259_v40 }
 0x683   : > { %v1389_v32 = vmul.f32 %v1388_v52, %v2728_v20  ;;  %v1432_v39 = vperm.slane %v1388_v52, 0 }
 0x685   : > { %v1390_v3 = vadd.f32 %v1389_v32, %v1260_v10  ;;  %v1433_v13 = vmul.f32 %v1432_v39, %v2651_v46  ;;  %v1434_v28 = vmul.f32 %v1432_v39, %v2648_v53  ;;  %v1435_v62 = vmul.f32 %v1432_v39, %v2654_v47 }
 0x686   : > { %v1436_v2 = vmul.f32 %v1432_v39, %v2660_v50  ;;  %v1437_v20 = vmul.f32 %v1432_v39, %v2677_v0  ;;  %v1438_v46 = vmul.f32 %v1432_v39, %v2675_v37  ;;  %v1439_v53 = vmul.f32 %v1432_v39, %v2682_v11 }
 0x687   : > { %1684 = vmatmul.msk.f32.vlgmr.msrb.gmra.mxu3 %vm262_vm0, %v1390_v3  ;;  %v1440_v47 = vmul.f32 %v1432_v39, %v2689_v55 }
 0x68f   : > { %1685 = vmatmul.msk.f32.vlgmr.msra.gmra.mxu3 %vm262_vm0, %v1433_v13 }
 0x697   : > { %1686 = vmatmul.msk.f32.gmra.mxu3 %vm262_vm0, %v1434_v28 }
 0x69f   : > { %1687 = vmatmul.msk.f32.gmra.mxu3 %vm262_vm0, %v1435_v62 }
 0x6a7   : > { %1688 = vmatmul.msk.f32.gmra.mxu3 %vm262_vm0, %v1436_v2 }
 0x6af   : > { %1689 = vmatmul.msk.f32.gmra.mxu3 %vm262_vm0, %v1437_v20 }
 0x6b7   : > { %1690 = vmatmul.msk.f32.gmra.mxu3 %vm262_vm0, %v1438_v46 }
 0x6bf   : > { %1691 = vmatmul.msk.f32.gmra.mxu3 %vm262_vm0, %v1439_v53 }
 0x6c7   : > { %1692 = vmatmul.msk.f32.gmra.mxu3 %vm262_vm0, %v1440_v47 }
 0x70a   : > { %v1415_v50 = vpop.f32.mrf.mxu3 }
 0x70b   : > { %1425 = vrot.lane.b32.xlu2 %v1415_v50, %s1985_s28  ;;  %1422 = vrot.lane.b32.xlu0 %v1415_v50, %s1986_s10  ;;  %s1601_s28 = sshll.u32 %s242_s16, 6  ;;  %s1699_s10 = sshll.u32 %s2047_s25, 6 }
 0x70c   : > { %1419 = vrot.lane.b32.xlu1 %v1415_v50, %s1988_s15  ;;  %s1531_s19 = scalar_lea.hbm %s2834_s6, %s1699_s10  ;;  %s244_s20 = scalar_lea.vmem [#allocation2], %s1601_s28 }
 0x70d   : > { %s1532_s26 = sshll.u32 %s244_s20, 4  ;;  %s1534_s29 = sshll.u32 %s1531_s19, 4  ;;  %s1533_s26 = int_to_ptr.vmem [resolvable:$true] %s1532_s26  ;;  %s1535_s29 = int_to_ptr.hbm [resolvable:$true] %s1534_s29 }
 0x70e   : > { %s1520_s25 = scalar_lea.sflag [#allocation3], %s242_s16  ;;  %s1935_s9 = sshra.s32 %s1535_s29, 4  ;;  %s1936_s9 = int_to_ptr.hbm [resolvable:$true] %s1935_s9 }
 0x70f   : > { %s1937_s11 = scalar_lea.hbm %s1936_s9, 64  ;;  %p1942_p0 = scmp.lt.s32.totalorder %s1936_s9, %s2834_s6 }
 0x710   : > { %p1938_p11 = scmp.ne.s32.totalorder %s1936_s9, %s1937_s11  ;;  %p1943_p1 = scmp.lt.s32.totalorder %s1941_s14, %s1937_s11 }
 0x712   : > { %v1487_v37 = vpop.f32.mrf.mxu3  ;;  %p1939_p12 = pnand %p1938_p11, %p2064_p5  ;;  %p1944_p2 = por %p1943_p1, %p1942_p0 }
 0x714   : > { %p1940_p13 = pneg %p1939_p12 }
 0x716   : > { %p1945_p3 = pnand %p1944_p2, %p1940_p13 }
 0x71a   : > { %v1490_v0 = vpop.f32.mrf.mxu3 }
 0x722   : > { %v1493_v49 = vpop.f32.mrf.mxu3 }
 0x72a   : > { %v1496_v11 = vpop.f32.mrf.mxu3 }
 0x732   : > { %v1499_v15 = vpop.f32.mrf.mxu3 }
 0x73a   : > { %v1502_v29 = vpop.f32.mrf.mxu3 }
 0x742   : > { %v1505_v55 = vpop.f32.mrf.mxu3 }
 0x74a   : > { %v1508_v42 = vpop.f32.mrf.mxu3 }
 0x765   : > { %v1426_v26 = vpop.permute.xlu2 %1425 }
 0x77d   : > { %v1423_v21 = vpop.permute.xlu0 %1422 }
 0x77e   : > { %v1420_v19 = vpop.permute.xlu1 %1419 }
 0x77f   : > { %v1428_v44 = vsel %vm262_vm0, %v1415_v50, %v1420_v19 }
 0x780   : > { %v1429_v16 = vsel %vm614_vm1, %v1428_v44, %v1423_v21 }
 0x781   : > { %v1431_v1 = vsel %vm1430_vm7, %v1429_v16, %v1426_v26 }
 0x782   : > { %v1445_v4 = vperm.slane %v1431_v1, 0 }
 0x784   : > { %v1488_v27 = vadd.f32 %v1487_v37, %v1445_v4  ;;  %v1491_v17 = vadd.f32 %v1490_v0, %v1445_v4  ;;  %v1494_v45 = vadd.f32 %v1493_v49, %v1445_v4  ;;  %v1497_v57 = vadd.f32 %v1496_v11, %v1445_v4 }
 0x785   : > { %v1500_v18 = vadd.f32 %v1499_v15, %v1445_v4  ;;  %v1503_v23 = vadd.f32 %v1502_v29, %v1445_v4  ;;  %v1506_v8 = vadd.f32 %v1505_v55, %v1445_v4  ;;  %v1509_v41 = vadd.f32 %v1508_v42, %v1445_v4 }
 0x786   : > { %1511 = vst [vmem:[%s244_s20] sm:$0xff] %v1488_v27 }
 0x787   : > { %1512 = vst [vmem:[%s244_s20 + $0x8] sm:$0xff] %v1491_v17 }
 0x788   : > { %1513 = vst [vmem:[%s244_s20 + $0x10] sm:$0xff] %v1494_v45 }
 0x789   : > { %1514 = vst [vmem:[%s244_s20 + $0x18] sm:$0xff] %v1497_v57 }
 0x78a   : > { %1515 = vst [vmem:[%s244_s20 + $0x20] sm:$0xff] %v1500_v18 }
 0x78b   : > { %1516 = vst [vmem:[%s244_s20 + $0x28] sm:$0xff] %v1503_v23 }
 0x78c   : > { %1517 = vst [vmem:[%s244_s20 + $0x30] sm:$0xff] %v1506_v8 }
 0x78d   : > { %1518 = vst [vmem:[%s244_s20 + $0x38] sm:$0xff] %v1509_v41 }
 0x78e   : > { %1948 = shalt.err (!%p1945_p3)
}
 0x78f   : > { %s1989_s16 = smov 128   ;;  %s1990_s10 = smov 8  }
 0x790   : > { %1724 = dma.vmem_to_hbm [thread:$0]  (%p2064_p5), %s1533_s26, 1024, %s1535_s29, %s1520_s25, %s1989_s16, %s1989_s16, %s1990_s10  }
 0x791 PF: > { %p1730_p4 = scmp.ge.s32.totalorder %s1983_s24, 2  ;;  %s1549_s17 = sand.u32 1, %s1971_s21  }
 0x792   : > { %s1550_s18 = scalar_lea.sflag [#allocation3], %s1549_s17 }
 0x793   : > { %p1727_p7 = pnand %p1730_p4, %p2068_p6 }
 0x795   : > { %p1728_p8 = pneg %p1727_p7 }
 0x797   : > { %1966 = dma.done.wait (%p1728_p8), %s1550_s18, 1024  }
 0x798   : > { %1968 = vsyncadd (%p1728_p8), %s1550_s18, 4294966272  ;;  %p16_p9 = scmp.ge.s32.totalorder %s2051_s27, 4   ;;  %s2837_s21 = smov %s1975_s22 }
 0x799   : > { %s2838_s22 = smov %s1979_s23  ;;  %s2839_s23 = smov %s2062_s30 }
 0x79a   : > { %s2840_s24 = smov %s2051_s27  ;;  %18 = sbr.rel (!%p16_p9) target bundleno = 3 (0x3), region = 79 }
 0x79f   :  { %1556 = vsyncpa [#allocation3], 1 }
 0x7a0   :  { %1558 = vsyncpa [#allocation3 + $0x1], 1 }

</bundles_post_ra>
